<compile_context>
chip_gen: v7x
topology: tpu7x:2x2x1
jax: 0.10.0
libtpu: 0.0.40
codegen_flags: <defaults>
</compile_context>

<pallas_src>
import functools

import numpy as np
import jax
import jax.numpy as jnp
from jax import lax
from jax.experimental import pallas as pl
from jax.experimental.pallas import tpu as pltpu

SELU_ALPHA = 1.6732632423543772848170429916717
SELU_SCALE = 1.0507009873554804934193349852946

MXU_DTYPE = jnp.float32   # set jnp.bfloat16 on v5e (bf16-native MXU)


# ----------------------------------------------------------------------------
# Fused LSTM-recurrence + heads kernel.
#   xproj_ref : (Tc, Bb, 4H)  precomputed x_t @ Wih for this time chunk (time-major)
#   whh_ref   : (H, 4H)       recurrent weight, columns [i|f|o|g]
#   wh_ref    : (H, 3K)       fused head weight, columns [shapeg|scaleg|gate]
#   bh_ref    : (1, 3K)       fused head bias (zeros for gate columns)
#   off_ref   : (1, 3K)       post-activation offsets (shape|scale|0)
#   out_ref   : (Tc, Bb, 3K)  head outputs for every step of this chunk
#   h_ref/c_ref: (Bb, H)      VMEM scratch carrying the LSTM state across chunks
# ----------------------------------------------------------------------------
def _fused_lstm_heads_kernel(xproj_ref, whh_ref, wh_ref, bh_ref, off_ref,
                             out_ref, h_ref, c_ref, *, k, inv_temp, t_chunk,
                             unroll):
    H = whh_ref.shape[0]
    Bb = h_ref.shape[0]
    K3 = wh_ref.shape[1]

    # First time-chunk of each batch shard: reset the carried state.
    @pl.when(pl.program_id(1) == 0)
    def _():
        h_ref[...] = jnp.zeros_like(h_ref)
        c_ref[...] = jnp.zeros_like(c_ref)

    # Constants loaded / built once per chunk (hoisted out of the serial loop).
    whh = whh_ref[...].astype(MXU_DTYPE)
    w_heads = wh_ref[...].astype(MXU_DTYPE)
    b_row = bh_ref[...]
    off_row = off_ref[...]
    cols = lax.broadcasted_iota(jnp.int32, (Bb, K3), 1)
    is_act = cols < 2 * k            # shapeg/scaleg columns -> SELU; gate -> /temp

    def step(t, carry):
        h, c = carry
        # One fused lane-dense (Bb,H)x(H,4H) matmul per step; the x-part is
        # precomputed, so only h @ Whh sits on the serial critical path.
        gates = xproj_ref[t] + jnp.dot(h.astype(MXU_DTYPE), whh,
                                       preferred_element_type=jnp.float32)
        sig = jax.nn.sigmoid(gates[:, :3 * H])     # contiguous [i|f|o] lanes
        g_g = jnp.tanh(gates[:, 3 * H:])
        i_g = sig[:, 0:H]
        f_g = sig[:, H:2 * H]
        o_g = sig[:, 2 * H:3 * H]
        c_new = f_g * c + i_g * g_g
        h_new = o_g * jnp.tanh(c_new)

        # Fused heads: tiny (Bb,H)x(H,3K) matmul + SELU/offsets/temp, riding in
        # MXU/VPU slot slack of the latency-bound recurrence; h never hits HBM.
        z = jnp.dot(h_new.astype(MXU_DTYPE), w_heads,
                    preferred_element_type=jnp.float32) + b_row
        selu_z = SELU_SCALE * jnp.where(z > 0.0, z, SELU_ALPHA * (jnp.exp(z) - 1.0))
        out_ref[t] = jnp.where(is_act, selu_z, z * inv_temp) + off_row
        return (h_new, c_new)

    h, c = lax.fori_loop(0, t_chunk, step, (h_ref[...], c_ref[...]),
                         unroll=unroll)
    h_ref[...] = h
    c_ref[...] = c


def fused_lstm_heads_pallas(xproj, whh, w_heads, b_heads, off_heads, temp, *,
                            t_chunk, n_batch_shards):
    T_pad, Bp, G4 = xproj.shape
    H = whh.shape[0]
    K3 = w_heads.shape[1]
    k = K3 // 3
    Bb = Bp // n_batch_shards
    n_t = T_pad // t_chunk
    unroll = True if t_chunk <= 8 else 8     # keep LLO visibility, bound vreg/icache

    kernel = functools.partial(_fused_lstm_heads_kernel, k=k,
                               inv_temp=1.0 / float(temp),
                               t_chunk=t_chunk, unroll=unroll)

    # Explicit VMEM audit: double-buffered xproj/out chunks + weights + state.
    footprint = (2 * t_chunk * Bb * G4 * 4 + 2 * t_chunk * Bb * K3 * 4
                 + 2 * (H * G4 + H * K3 + 2 * K3) * 4 + 2 * Bb * H * 4)
    vmem_limit = int(min(64 << 20, max(4 * footprint, 16 << 20)))

    return pl.pallas_call(
        kernel,
        out_shape=jax.ShapeDtypeStruct((T_pad, Bp, K3), jnp.float32),
        grid=(n_batch_shards, n_t),
        in_specs=[
            pl.BlockSpec((t_chunk, Bb, G4), lambda b, t: (t, b, 0)),
            pl.BlockSpec((H, G4), lambda b, t: (0, 0)),
            pl.BlockSpec((H, K3), lambda b, t: (0, 0)),
            pl.BlockSpec((1, K3), lambda b, t: (0, 0)),
            pl.BlockSpec((1, K3), lambda b, t: (0, 0)),
        ],
        out_specs=pl.BlockSpec((t_chunk, Bb, K3), lambda b, t: (t, b, 0)),
        scratch_shapes=[pltpu.VMEM((Bb, H), jnp.float32),    # h carry
                        pltpu.VMEM((Bb, H), jnp.float32)],   # c carry
        compiler_params=pltpu.CompilerParams(
            dimension_semantics=("parallel", "arbitrary"),
            vmem_limit_bytes=vmem_limit),
    )(xproj, whh, w_heads, b_heads, off_heads)


# ----------------------------------------------------------------------------
# Full DRSM forward (glue in plain JAX, hot path in the single fused kernel).
# ----------------------------------------------------------------------------
def drsm_forward(x, params, *, max_t_chunk=128):
    B, T, _ = x.shape
    H = params["whh"].shape[0]
    K3 = params["w_heads"].shape[1]
    K = K3 // 3

    mask = jnp.logical_not(jnp.isnan(x[:, :, 0])).reshape(-1)   # (B*T,) batch-major
    x = jnp.nan_to_num(x, nan=0.0)                              # x[isnan(x)] = 0

    # Pad batch to a sublane multiple of 8 (dense vregs / unmasked-ish stores).
    Bp = int(np.ceil(B / 8) * 8)
    if Bp != B:
        x = jnp.pad(x, ((0, Bp - B), (0, 0), (0, 0)))

    # v7x: shard independent sequences across the 2 TensorCores when big enough.
    n_shards = 2 if (Bp >= 16 and Bp % 16 == 0) else 1

    # Time chunking: bound VMEM and let the xproj chunk DMA double-buffer behind
    # the serial recurrence.
    bytes_per_step = Bp * 4 * H * 4
    t_chunk = int(max(1, min(T, max_t_chunk, (1 << 20) // max(1, bytes_per_step))))
    T_pad = int(np.ceil(T / t_chunk) * t_chunk)

    # Hoisted input projection: one (B*T,D)x(D,4H) matmul, emitted time-major.
    xproj = jnp.einsum("btd,dg->tbg", x, params["wih"],
                       precision=lax.Precision.HIGHEST)          # (T, Bp, 4H)
    if T_pad != T:
        xproj = jnp.pad(xproj, ((0, T_pad - T), (0, 0), (0, 0)))

    out = fused_lstm_heads_pallas(xproj, params["whh"], params["w_heads"],
                                  params["b_heads"], params["off_heads"],
                                  params["temp"], t_chunk=t_chunk,
                                  n_batch_shards=n_shards)       # (T_pad, Bp, 3K)

    # Drop padding; reorder only the tiny (B*T, 3K) result to torch's
    # batch-major .view(-1, H) ordering (instead of transposing the big hs).
    out = jnp.transpose(out[:T, :B, :], (1, 0, 2)).reshape(B * T, K3)
    return out[:, 0:K], out[:, K:2 * K], out[:, 2 * K:3 * K], mask


# ----------------------------------------------------------------------------
# Parameter init (matches PyTorch module shapes; dist='Weibull', bias-free LSTM
# exactly as in the spec: nn.LSTM(..., bias=False, batch_first=True)).
# ----------------------------------------------------------------------------
def init_params(key, D, H, K, temp=1000.0):
    ks = jax.random.split(key, 7)
    bnd = 1.0 / np.sqrt(H)
    # PyTorch layout: weight_ih (4H, D), weight_hh (4H, H), gate row order i,f,g,o.
    w_ih = jax.random.uniform(ks[0], (4 * H, D), jnp.float32, -bnd, bnd)
    w_hh = jax.random.uniform(ks[1], (4 * H, H), jnp.float32, -bnd, bnd)
    # Repack gate order to [i|f|o|g] so one sigmoid covers a contiguous 3H slice.
    perm = np.concatenate([np.arange(0, H), np.arange(H, 2 * H),
                           np.arange(3 * H, 4 * H), np.arange(2 * H, 3 * H)])
    wih = w_ih[perm].T                             # (D, 4H), columns [i|f|o|g]
    whh = w_hh[perm].T                             # (H, 4H)

    w_shapeg = jax.random.uniform(ks[2], (K, H), jnp.float32, -bnd, bnd)
    b_shapeg = jax.random.uniform(ks[3], (1, K), jnp.float32, -bnd, bnd)
    w_scaleg = jax.random.uniform(ks[4], (K, H), jnp.float32, -bnd, bnd)
    b_scaleg = jax.random.uniform(ks[5], (1, K), jnp.float32, -bnd, bnd)
    w_gate = jax.random.uniform(ks[6], (K, H), jnp.float32, -bnd, bnd)

    shape_p = -jnp.ones((1, K), jnp.float32)       # Weibull init: -ones(k)
    scale_p = -jnp.ones((1, K), jnp.float32)
    zeros_k = jnp.zeros((1, K), jnp.float32)

    # Fused head parameters: columns [shapeg | scaleg | gate].
    w_heads = jnp.concatenate([w_shapeg.T, w_scaleg.T, w_gate.T], axis=1)  # (H, 3K)
    b_heads = jnp.concatenate([b_shapeg, b_scaleg, zeros_k], axis=1)       # gate bias=False
    off_heads = jnp.concatenate([shape_p, scale_p, zeros_k], axis=1)       # post-SELU offsets

    return dict(wih=wih, whh=whh, w_heads=w_heads, b_heads=b_heads,
                off_heads=off_heads, temp=float(temp))


# ----------------------------------------------------------------------------
# Pure-JAX reference (same math, unfused heads) for validation.
# Uses the same packed [i|f|o|g] column convention as the kernel.
# ----------------------------------------------------------------------------
def drsm_reference(x, params):
    B, T, _ = x.shape
    H = params["whh"].shape[0]
    K = params["w_heads"].shape[1] // 3
    hp = lax.Precision.HIGHEST
    mask = jnp.logical_not(jnp.isnan(x[:, :, 0])).reshape(-1)
    x = jnp.nan_to_num(x, nan=0.0)
    wih, whh = params["wih"], params["whh"]

    def cell(carry, x_t):
        h, c = carry
        g = jnp.dot(x_t, wih, precision=hp) + jnp.dot(h, whh, precision=hp)
        i = jax.nn.sigmoid(g[:, 0:H])
        f = jax.nn.sigmoid(g[:, H:2 * H])
        o = jax.nn.sigmoid(g[:, 2 * H:3 * H])
        gg = jnp.tanh(g[:, 3 * H:4 * H])
        c = f * c + i * gg
        h = o * jnp.tanh(c)
        return (h, c), h

    h0 = jnp.zeros((B, H), jnp.float32)
    c0 = jnp.zeros((B, H), jnp.float32)
    _, hs = lax.scan(cell, (h0, c0), jnp.transpose(x, (1, 0, 2)))
    xrep = jnp.transpose(hs, (1, 0, 2)).reshape(B * T, H)

    def selu(v):
        return SELU_SCALE * jnp.where(v > 0.0, v, SELU_ALPHA * (jnp.exp(v) - 1.0))

    wsh, wsc, wg = (params["w_heads"][:, 0:K], params["w_heads"][:, K:2 * K],
                    params["w_heads"][:, 2 * K:])
    bsh, bsc = params["b_heads"][:, 0:K], params["b_heads"][:, K:2 * K]
    shp, scl = params["off_heads"][:, 0:K], params["off_heads"][:, K:2 * K]

    sh = selu(jnp.dot(xrep, wsh, precision=hp) + bsh) + shp
    sc = selu(jnp.dot(xrep, wsc, precision=hp) + bsc) + scl
    gt = jnp.dot(xrep, wg, precision=hp) / params["temp"]
    return sh, sc, gt, mask


if __name__ == "__main__":
    # 4H = 128 -> the fused gate matmul exactly fills the 128-lane MXU width.
    B, T, D, H, K = 2, 8, 4, 32, 4

    key = jax.random.PRNGKey(0)
    kx, kp = jax.random.split(key)
    x = jax.random.normal(kx, (B, T, D), jnp.float32)
    # pad last two time steps of sequence 1 with NaN (ragged input, DSM-style)
    x = x.at[1, T - 2:, :].set(jnp.nan)

    params = init_params(kp, D, H, K, temp=1000.0)

    shape_o, scale_o, gate_o, mask = drsm_forward(x, params)
    jax.block_until_ready((shape_o, scale_o, gate_o, mask))

    # validate against pure-JAX reference
    rs, rc, rg, rm = drsm_reference(x, params)
    np.testing.assert_allclose(np.asarray(shape_o), np.asarray(rs), rtol=1e-2, atol=1e-2)
    np.testing.assert_allclose(np.asarray(scale_o), np.asarray(rc), rtol=1e-2, atol=1e-2)
    np.testing.assert_allclose(np.asarray(gate_o), np.asarray(rg), rtol=1e-2, atol=1e-2)
    np.testing.assert_array_equal(np.asarray(mask), np.asarray(rm))

    # TODO(synk): the dynamic-shape boolean gather `xrep[inputmask]` has no Pallas
    # equivalent (data-dependent output size); applied host-side like torch.
    # TODO(synk): only layers=1 (as constructed here) and typ='LSTM' are
    # implemented; chain fused_lstm_heads_pallas-style recurrences for num_layers > 1.
    m = np.asarray(mask)
    shape_f = np.asarray(shape_o)[m]
    scale_f = np.asarray(scale_o)[m]
    gate_f = np.asarray(gate_o)[m]
    assert shape_f.shape == (int(m.sum()), K)
    assert scale_f.shape == (int(m.sum()), K)
    assert gate_f.shape == (int(m.sum()), K)

    print("KERNEL_OK")
</pallas_src>

<mosaic_0001>
module attributes {stable_mosaic.version = 11 : i64} {
  func.func @_fused_lstm_heads_kernel(%arg0: i32, %arg1: i32, %arg2: memref<8x8x128xf32, #tpu.memory_space<vmem>>, %arg3: memref<32x128xf32, #tpu.memory_space<vmem>>, %arg4: memref<32x12xf32, #tpu.memory_space<vmem>>, %arg5: memref<1x12xf32, #tpu.memory_space<vmem>>, %arg6: memref<1x12xf32, #tpu.memory_space<vmem>>, %arg7: memref<8x8x12xf32, #tpu.memory_space<vmem>>, %arg8: memref<8x32xf32, #tpu.memory_space<vmem>>, %arg9: memref<8x32xf32, #tpu.memory_space<vmem>>) attributes {dimension_semantics = [#tpu.dimension_semantics<parallel>, #tpu.dimension_semantics<arbitrary>], iteration_bounds = array<i64: 1, 1>, scalar_prefetch = 0 : i64, scratch_operands = 2 : i64, tpu.core_type = #tpu.core_type<tc>, window_params = [{transform_indices = @transform_0, window_bounds = array<i64: 8, 8, 128>}, {pipeline_mode = #tpu.pipeline_mode<synchronous>, transform_indices = @transform_1, window_bounds = array<i64: 32, 128>}, {pipeline_mode = #tpu.pipeline_mode<synchronous>, transform_indices = @transform_2, window_bounds = array<i64: 32, 12>}, {pipeline_mode = #tpu.pipeline_mode<synchronous>, transform_indices = @transform_3, window_bounds = array<i64: 1, 12>}, {pipeline_mode = #tpu.pipeline_mode<synchronous>, transform_indices = @transform_4, window_bounds = array<i64: 1, 12>}, {transform_indices = @transform_5, window_bounds = array<i64: 8, 8, 12>}]} {
    %c0_i32 = arith.constant 0 : i32
    %0 = arith.cmpi eq, %arg1, %c0_i32 : i32
    %1 = arith.extui %0 : i1 to i32
    %c0_i32_0 = arith.constant 0 : i32
    %2 = arith.cmpi ne, %1, %c0_i32_0 : i32
    scf.if %2 {
      %cst_113 = arith.constant 0.000000e+00 : f32
      %358 = vector.broadcast %cst_113 : f32 to vector<8x32xf32>
      %c0_114 = arith.constant 0 : index
      %c0_115 = arith.constant 0 : index
      %359 = vector.load %arg8[%c0_114, %c0_115] : memref<8x32xf32, #tpu.memory_space<vmem>>, vector<8x32xf32>
      tpu.vector_store %arg8[%c0_114, %c0_115], %358 {strides = array<i32>} : memref<8x32xf32, #tpu.memory_space<vmem>>, vector<8x32xf32>,
      %cst_116 = arith.constant 0.000000e+00 : f32
      %360 = vector.broadcast %cst_116 : f32 to vector<8x32xf32>
      %c0_117 = arith.constant 0 : index
      %c0_118 = arith.constant 0 : index
      %361 = vector.load %arg9[%c0_117, %c0_118] : memref<8x32xf32, #tpu.memory_space<vmem>>, vector<8x32xf32>
      tpu.vector_store %arg9[%c0_117, %c0_118], %360 {strides = array<i32>} : memref<8x32xf32, #tpu.memory_space<vmem>>, vector<8x32xf32>,
    } else {
    }
    %c0 = arith.constant 0 : index
    %c0_1 = arith.constant 0 : index
    %3 = vector.load %arg3[%c0, %c0_1] : memref<32x128xf32, #tpu.memory_space<vmem>>, vector<32x128xf32>
    %c0_2 = arith.constant 0 : index
    %c0_3 = arith.constant 0 : index
    %4 = vector.load %arg4[%c0_2, %c0_3] : memref<32x12xf32, #tpu.memory_space<vmem>>, vector<32x12xf32>
    %c0_4 = arith.constant 0 : index
    %c0_5 = arith.constant 0 : index
    %5 = vector.load %arg5[%c0_4, %c0_5] : memref<1x12xf32, #tpu.memory_space<vmem>>, vector<1x12xf32>
    %c0_6 = arith.constant 0 : index
    %c0_7 = arith.constant 0 : index
    %6 = vector.load %arg6[%c0_6, %c0_7] : memref<1x12xf32, #tpu.memory_space<vmem>>, vector<1x12xf32>
    %7 = tpu.iota {dimensions = array<i32: 1>} : vector<8x12xi32>
    %c8_i32 = arith.constant 8 : i32
    %8 = vector.broadcast %c8_i32 : i32 to vector<8x12xi32>
    %9 = arith.cmpi slt, %7, %8 : vector<8x12xi32>
    %c0_8 = arith.constant 0 : index
    %c0_9 = arith.constant 0 : index
    %10 = vector.load %arg8[%c0_8, %c0_9] : memref<8x32xf32, #tpu.memory_space<vmem>>, vector<8x32xf32>
    %c0_10 = arith.constant 0 : index
    %c0_11 = arith.constant 0 : index
    %11 = vector.load %arg9[%c0_10, %c0_11] : memref<8x32xf32, #tpu.memory_space<vmem>>, vector<8x32xf32>
    %c0_i32_12 = arith.constant 0 : i32
    %12 = arith.index_cast %c0_i32_12 : i32 to index
    %c0_13 = arith.constant 0 : index
    %c0_14 = arith.constant 0 : index
    %13 = vector.load %arg2[%12, %c0_13, %c0_14] : memref<8x8x128xf32, #tpu.memory_space<vmem>>, vector<1x8x128xf32>
    %14 = vector.shape_cast %13 : vector<1x8x128xf32> to vector<8x128xf32>
    %cst = arith.constant dense<0.000000e+00> : vector<8x128xf32>
    %15 = tpu.matmul %10, %3, %cst {dimension_numbers = #tpu.dot_dimension_numbers<[1], [0], [0], [1], [0, 0, 1, 1], [], []>} : vector<8x32xf32>, vector<32x128xf32>, vector<8x128xf32> -> vector<8x128xf32>
    %16 = arith.addf %14, %15 : vector<8x128xf32>
    %17 = vector.extract_strided_slice %16 {offsets = [0, 0], sizes = [8, 96], strides = [1, 1]} : vector<8x128xf32> to vector<8x96xf32>
    %18 = arith.negf %17 : vector<8x96xf32>
    %19 = math.exp %18 : vector<8x96xf32>
    %cst_15 = arith.constant 1.000000e+00 : f32
    %20 = vector.broadcast %cst_15 : f32 to vector<8x96xf32>
    %21 = arith.addf %20, %19 : vector<8x96xf32>
    %22 = arith.divf %20, %21 : vector<8x96xf32>
    %23 = vector.extract_strided_slice %16 {offsets = [0, 96], sizes = [8, 32], strides = [1, 1]} : vector<8x128xf32> to vector<8x32xf32>
    %24 = math.tanh %23 : vector<8x32xf32>
    %25 = vector.extract_strided_slice %22 {offsets = [0, 0], sizes = [8, 32], strides = [1, 1]} : vector<8x96xf32> to vector<8x32xf32>
    %26 = vector.extract_strided_slice %22 {offsets = [0, 32], sizes = [8, 32], strides = [1, 1]} : vector<8x96xf32> to vector<8x32xf32>
    %27 = vector.extract_strided_slice %22 {offsets = [0, 64], sizes = [8, 32], strides = [1, 1]} : vector<8x96xf32> to vector<8x32xf32>
    %28 = arith.mulf %26, %11 : vector<8x32xf32>
    %29 = arith.mulf %25, %24 : vector<8x32xf32>
    %30 = arith.addf %28, %29 : vector<8x32xf32>
    %31 = math.tanh %30 : vector<8x32xf32>
    %32 = arith.mulf %27, %31 : vector<8x32xf32>
    %cst_16 = arith.constant dense<0.000000e+00> : vector<8x12xf32>
    %33 = tpu.matmul %32, %4, %cst_16 {dimension_numbers = #tpu.dot_dimension_numbers<[1], [0], [0], [1], [0, 0, 1, 1], [], []>} : vector<8x32xf32>, vector<32x12xf32>, vector<8x12xf32> -> vector<8x12xf32>
    %34 = vector.broadcast %5 : vector<1x12xf32> to vector<8x12xf32>
    %35 = arith.addf %33, %34 : vector<8x12xf32>
    %cst_17 = arith.constant 0.000000e+00 : f32
    %36 = vector.broadcast %cst_17 : f32 to vector<8x12xf32>
    %37 = arith.cmpf ogt, %35, %36 : vector<8x12xf32>
    %38 = math.exp %35 : vector<8x12xf32>
    %cst_18 = arith.constant 1.000000e+00 : f32
    %39 = vector.broadcast %cst_18 : f32 to vector<8x12xf32>
    %40 = arith.subf %38, %39 : vector<8x12xf32>
    %cst_19 = arith.constant 1.67326319 : f32
    %41 = vector.broadcast %cst_19 : f32 to vector<8x12xf32>
    %42 = arith.mulf %41, %40 : vector<8x12xf32>
    %43 = arith.select %37, %35, %42 : vector<8x12xi1>, vector<8x12xf32>
    %cst_20 = arith.constant 1.05070102 : f32
    %44 = vector.broadcast %cst_20 : f32 to vector<8x12xf32>
    %45 = arith.mulf %44, %43 : vector<8x12xf32>
    %cst_21 = arith.constant 1.000000e-03 : f32
    %46 = vector.broadcast %cst_21 : f32 to vector<8x12xf32>
    %47 = arith.mulf %35, %46 : vector<8x12xf32>
    %48 = arith.select %9, %45, %47 : vector<8x12xi1>, vector<8x12xf32>
    %49 = vector.broadcast %6 : vector<1x12xf32> to vector<8x12xf32>
    %50 = arith.addf %48, %49 : vector<8x12xf32>
    %51 = arith.index_cast %c0_i32_12 : i32 to index
    %c0_22 = arith.constant 0 : index
    %c0_23 = arith.constant 0 : index
    %52 = vector.load %arg7[%51, %c0_22, %c0_23] : memref<8x8x12xf32, #tpu.memory_space<vmem>>, vector<1x8x12xf32>
    %53 = vector.shape_cast %52 : vector<1x8x12xf32> to vector<8x12xf32>
    %54 = vector.shape_cast %50 : vector<8x12xf32> to vector<1x8x12xf32>
    tpu.vector_store %arg7[%51, %c0_22, %c0_23], %54 {strides = array<i32>} : memref<8x8x12xf32, #tpu.memory_space<vmem>>, vector<1x8x12xf32>,
    %c1_i32 = arith.constant 1 : i32
    %55 = arith.index_cast %c1_i32 : i32 to index
    %c0_24 = arith.constant 0 : index
    %c0_25 = arith.constant 0 : index
    %56 = vector.load %arg2[%55, %c0_24, %c0_25] : memref<8x8x128xf32, #tpu.memory_space<vmem>>, vector<1x8x128xf32>
    %57 = vector.shape_cast %56 : vector<1x8x128xf32> to vector<8x128xf32>
    %cst_26 = arith.constant dense<0.000000e+00> : vector<8x128xf32>
    %58 = tpu.matmul %32, %3, %cst_26 {dimension_numbers = #tpu.dot_dimension_numbers<[1], [0], [0], [1], [0, 0, 1, 1], [], []>} : vector<8x32xf32>, vector<32x128xf32>, vector<8x128xf32> -> vector<8x128xf32>
    %59 = arith.addf %57, %58 : vector<8x128xf32>
    %60 = vector.extract_strided_slice %59 {offsets = [0, 0], sizes = [8, 96], strides = [1, 1]} : vector<8x128xf32> to vector<8x96xf32>
    %61 = arith.negf %60 : vector<8x96xf32>
    %62 = math.exp %61 : vector<8x96xf32>
    %cst_27 = arith.constant 1.000000e+00 : f32
    %63 = vector.broadcast %cst_27 : f32 to vector<8x96xf32>
    %64 = arith.addf %63, %62 : vector<8x96xf32>
    %65 = arith.divf %63, %64 : vector<8x96xf32>
    %66 = vector.extract_strided_slice %59 {offsets = [0, 96], sizes = [8, 32], strides = [1, 1]} : vector<8x128xf32> to vector<8x32xf32>
    %67 = math.tanh %66 : vector<8x32xf32>
    %68 = vector.extract_strided_slice %65 {offsets = [0, 0], sizes = [8, 32], strides = [1, 1]} : vector<8x96xf32> to vector<8x32xf32>
    %69 = vector.extract_strided_slice %65 {offsets = [0, 32], sizes = [8, 32], strides = [1, 1]} : vector<8x96xf32> to vector<8x32xf32>
    %70 = vector.extract_strided_slice %65 {offsets = [0, 64], sizes = [8, 32], strides = [1, 1]} : vector<8x96xf32> to vector<8x32xf32>
    %71 = arith.mulf %69, %30 : vector<8x32xf32>
    %72 = arith.mulf %68, %67 : vector<8x32xf32>
    %73 = arith.addf %71, %72 : vector<8x32xf32>
    %74 = math.tanh %73 : vector<8x32xf32>
    %75 = arith.mulf %70, %74 : vector<8x32xf32>
    %cst_28 = arith.constant dense<0.000000e+00> : vector<8x12xf32>
    %76 = tpu.matmul %75, %4, %cst_28 {dimension_numbers = #tpu.dot_dimension_numbers<[1], [0], [0], [1], [0, 0, 1, 1], [], []>} : vector<8x32xf32>, vector<32x12xf32>, vector<8x12xf32> -> vector<8x12xf32>
    %77 = vector.broadcast %5 : vector<1x12xf32> to vector<8x12xf32>
    %78 = arith.addf %76, %77 : vector<8x12xf32>
    %cst_29 = arith.constant 0.000000e+00 : f32
    %79 = vector.broadcast %cst_29 : f32 to vector<8x12xf32>
    %80 = arith.cmpf ogt, %78, %79 : vector<8x12xf32>
    %81 = math.exp %78 : vector<8x12xf32>
    %cst_30 = arith.constant 1.000000e+00 : f32
    %82 = vector.broadcast %cst_30 : f32 to vector<8x12xf32>
    %83 = arith.subf %81, %82 : vector<8x12xf32>
    %cst_31 = arith.constant 1.67326319 : f32
    %84 = vector.broadcast %cst_31 : f32 to vector<8x12xf32>
    %85 = arith.mulf %84, %83 : vector<8x12xf32>
    %86 = arith.select %80, %78, %85 : vector<8x12xi1>, vector<8x12xf32>
    %cst_32 = arith.constant 1.05070102 : f32
    %87 = vector.broadcast %cst_32 : f32 to vector<8x12xf32>
    %88 = arith.mulf %87, %86 : vector<8x12xf32>
    %cst_33 = arith.constant 1.000000e-03 : f32
    %89 = vector.broadcast %cst_33 : f32 to vector<8x12xf32>
    %90 = arith.mulf %78, %89 : vector<8x12xf32>
    %91 = arith.select %9, %88, %90 : vector<8x12xi1>, vector<8x12xf32>
    %92 = vector.broadcast %6 : vector<1x12xf32> to vector<8x12xf32>
    %93 = arith.addf %91, %92 : vector<8x12xf32>
    %94 = arith.index_cast %c1_i32 : i32 to index
    %c0_34 = arith.constant 0 : index
    %c0_35 = arith.constant 0 : index
    %95 = vector.load %arg7[%94, %c0_34, %c0_35] : memref<8x8x12xf32, #tpu.memory_space<vmem>>, vector<1x8x12xf32>
    %96 = vector.shape_cast %95 : vector<1x8x12xf32> to vector<8x12xf32>
    %97 = vector.shape_cast %93 : vector<8x12xf32> to vector<1x8x12xf32>
    tpu.vector_store %arg7[%94, %c0_34, %c0_35], %97 {strides = array<i32>} : memref<8x8x12xf32, #tpu.memory_space<vmem>>, vector<1x8x12xf32>,
    %c2_i32 = arith.constant 2 : i32
    %98 = arith.index_cast %c2_i32 : i32 to index
    %c0_36 = arith.constant 0 : index
    %c0_37 = arith.constant 0 : index
    %99 = vector.load %arg2[%98, %c0_36, %c0_37] : memref<8x8x128xf32, #tpu.memory_space<vmem>>, vector<1x8x128xf32>
    %100 = vector.shape_cast %99 : vector<1x8x128xf32> to vector<8x128xf32>
    %cst_38 = arith.constant dense<0.000000e+00> : vector<8x128xf32>
    %101 = tpu.matmul %75, %3, %cst_38 {dimension_numbers = #tpu.dot_dimension_numbers<[1], [0], [0], [1], [0, 0, 1, 1], [], []>} : vector<8x32xf32>, vector<32x128xf32>, vector<8x128xf32> -> vector<8x128xf32>
    %102 = arith.addf %100, %101 : vector<8x128xf32>
    %103 = vector.extract_strided_slice %102 {offsets = [0, 0], sizes = [8, 96], strides = [1, 1]} : vector<8x128xf32> to vector<8x96xf32>
    %104 = arith.negf %103 : vector<8x96xf32>
    %105 = math.exp %104 : vector<8x96xf32>
    %cst_39 = arith.constant 1.000000e+00 : f32
    %106 = vector.broadcast %cst_39 : f32 to vector<8x96xf32>
    %107 = arith.addf %106, %105 : vector<8x96xf32>
    %108 = arith.divf %106, %107 : vector<8x96xf32>
    %109 = vector.extract_strided_slice %102 {offsets = [0, 96], sizes = [8, 32], strides = [1, 1]} : vector<8x128xf32> to vector<8x32xf32>
    %110 = math.tanh %109 : vector<8x32xf32>
    %111 = vector.extract_strided_slice %108 {offsets = [0, 0], sizes = [8, 32], strides = [1, 1]} : vector<8x96xf32> to vector<8x32xf32>
    %112 = vector.extract_strided_slice %108 {offsets = [0, 32], sizes = [8, 32], strides = [1, 1]} : vector<8x96xf32> to vector<8x32xf32>
    %113 = vector.extract_strided_slice %108 {offsets = [0, 64], sizes = [8, 32], strides = [1, 1]} : vector<8x96xf32> to vector<8x32xf32>
    %114 = arith.mulf %112, %73 : vector<8x32xf32>
    %115 = arith.mulf %111, %110 : vector<8x32xf32>
    %116 = arith.addf %114, %115 : vector<8x32xf32>
    %117 = math.tanh %116 : vector<8x32xf32>
    %118 = arith.mulf %113, %117 : vector<8x32xf32>
    %cst_40 = arith.constant dense<0.000000e+00> : vector<8x12xf32>
    %119 = tpu.matmul %118, %4, %cst_40 {dimension_numbers = #tpu.dot_dimension_numbers<[1], [0], [0], [1], [0, 0, 1, 1], [], []>} : vector<8x32xf32>, vector<32x12xf32>, vector<8x12xf32> -> vector<8x12xf32>
    %120 = vector.broadcast %5 : vector<1x12xf32> to vector<8x12xf32>
    %121 = arith.addf %119, %120 : vector<8x12xf32>
    %cst_41 = arith.constant 0.000000e+00 : f32
    %122 = vector.broadcast %cst_41 : f32 to vector<8x12xf32>
    %123 = arith.cmpf ogt, %121, %122 : vector<8x12xf32>
    %124 = math.exp %121 : vector<8x12xf32>
    %cst_42 = arith.constant 1.000000e+00 : f32
    %125 = vector.broadcast %cst_42 : f32 to vector<8x12xf32>
    %126 = arith.subf %124, %125 : vector<8x12xf32>
    %cst_43 = arith.constant 1.67326319 : f32
    %127 = vector.broadcast %cst_43 : f32 to vector<8x12xf32>
    %128 = arith.mulf %127, %126 : vector<8x12xf32>
    %129 = arith.select %123, %121, %128 : vector<8x12xi1>, vector<8x12xf32>
    %cst_44 = arith.constant 1.05070102 : f32
    %130 = vector.broadcast %cst_44 : f32 to vector<8x12xf32>
    %131 = arith.mulf %130, %129 : vector<8x12xf32>
    %cst_45 = arith.constant 1.000000e-03 : f32
    %132 = vector.broadcast %cst_45 : f32 to vector<8x12xf32>
    %133 = arith.mulf %121, %132 : vector<8x12xf32>
    %134 = arith.select %9, %131, %133 : vector<8x12xi1>, vector<8x12xf32>
    %135 = vector.broadcast %6 : vector<1x12xf32> to vector<8x12xf32>
    %136 = arith.addf %134, %135 : vector<8x12xf32>
    %137 = arith.index_cast %c2_i32 : i32 to index
    %c0_46 = arith.constant 0 : index
    %c0_47 = arith.constant 0 : index
    %138 = vector.load %arg7[%137, %c0_46, %c0_47] : memref<8x8x12xf32, #tpu.memory_space<vmem>>, vector<1x8x12xf32>
    %139 = vector.shape_cast %138 : vector<1x8x12xf32> to vector<8x12xf32>
    %140 = vector.shape_cast %136 : vector<8x12xf32> to vector<1x8x12xf32>
    tpu.vector_store %arg7[%137, %c0_46, %c0_47], %140 {strides = array<i32>} : memref<8x8x12xf32, #tpu.memory_space<vmem>>, vector<1x8x12xf32>,
    %c3_i32 = arith.constant 3 : i32
    %141 = arith.index_cast %c3_i32 : i32 to index
    %c0_48 = arith.constant 0 : index
    %c0_49 = arith.constant 0 : index
    %142 = vector.load %arg2[%141, %c0_48, %c0_49] : memref<8x8x128xf32, #tpu.memory_space<vmem>>, vector<1x8x128xf32>
    %143 = vector.shape_cast %142 : vector<1x8x128xf32> to vector<8x128xf32>
    %cst_50 = arith.constant dense<0.000000e+00> : vector<8x128xf32>
    %144 = tpu.matmul %118, %3, %cst_50 {dimension_numbers = #tpu.dot_dimension_numbers<[1], [0], [0], [1], [0, 0, 1, 1], [], []>} : vector<8x32xf32>, vector<32x128xf32>, vector<8x128xf32> -> vector<8x128xf32>
    %145 = arith.addf %143, %144 : vector<8x128xf32>
    %146 = vector.extract_strided_slice %145 {offsets = [0, 0], sizes = [8, 96], strides = [1, 1]} : vector<8x128xf32> to vector<8x96xf32>
    %147 = arith.negf %146 : vector<8x96xf32>
    %148 = math.exp %147 : vector<8x96xf32>
    %cst_51 = arith.constant 1.000000e+00 : f32
    %149 = vector.broadcast %cst_51 : f32 to vector<8x96xf32>
    %150 = arith.addf %149, %148 : vector<8x96xf32>
    %151 = arith.divf %149, %150 : vector<8x96xf32>
    %152 = vector.extract_strided_slice %145 {offsets = [0, 96], sizes = [8, 32], strides = [1, 1]} : vector<8x128xf32> to vector<8x32xf32>
    %153 = math.tanh %152 : vector<8x32xf32>
    %154 = vector.extract_strided_slice %151 {offsets = [0, 0], sizes = [8, 32], strides = [1, 1]} : vector<8x96xf32> to vector<8x32xf32>
    %155 = vector.extract_strided_slice %151 {offsets = [0, 32], sizes = [8, 32], strides = [1, 1]} : vector<8x96xf32> to vector<8x32xf32>
    %156 = vector.extract_strided_slice %151 {offsets = [0, 64], sizes = [8, 32], strides = [1, 1]} : vector<8x96xf32> to vector<8x32xf32>
    %157 = arith.mulf %155, %116 : vector<8x32xf32>
    %158 = arith.mulf %154, %153 : vector<8x32xf32>
    %159 = arith.addf %157, %158 : vector<8x32xf32>
    %160 = math.tanh %159 : vector<8x32xf32>
    %161 = arith.mulf %156, %160 : vector<8x32xf32>
    %cst_52 = arith.constant dense<0.000000e+00> : vector<8x12xf32>
    %162 = tpu.matmul %161, %4, %cst_52 {dimension_numbers = #tpu.dot_dimension_numbers<[1], [0], [0], [1], [0, 0, 1, 1], [], []>} : vector<8x32xf32>, vector<32x12xf32>, vector<8x12xf32> -> vector<8x12xf32>
    %163 = vector.broadcast %5 : vector<1x12xf32> to vector<8x12xf32>
    %164 = arith.addf %162, %163 : vector<8x12xf32>
    %cst_53 = arith.constant 0.000000e+00 : f32
    %165 = vector.broadcast %cst_53 : f32 to vector<8x12xf32>
    %166 = arith.cmpf ogt, %164, %165 : vector<8x12xf32>
    %167 = math.exp %164 : vector<8x12xf32>
    %cst_54 = arith.constant 1.000000e+00 : f32
    %168 = vector.broadcast %cst_54 : f32 to vector<8x12xf32>
    %169 = arith.subf %167, %168 : vector<8x12xf32>
    %cst_55 = arith.constant 1.67326319 : f32
    %170 = vector.broadcast %cst_55 : f32 to vector<8x12xf32>
    %171 = arith.mulf %170, %169 : vector<8x12xf32>
    %172 = arith.select %166, %164, %171 : vector<8x12xi1>, vector<8x12xf32>
    %cst_56 = arith.constant 1.05070102 : f32
    %173 = vector.broadcast %cst_56 : f32 to vector<8x12xf32>
    %174 = arith.mulf %173, %172 : vector<8x12xf32>
    %cst_57 = arith.constant 1.000000e-03 : f32
    %175 = vector.broadcast %cst_57 : f32 to vector<8x12xf32>
    %176 = arith.mulf %164, %175 : vector<8x12xf32>
    %177 = arith.select %9, %174, %176 : vector<8x12xi1>, vector<8x12xf32>
    %178 = vector.broadcast %6 : vector<1x12xf32> to vector<8x12xf32>
    %179 = arith.addf %177, %178 : vector<8x12xf32>
    %180 = arith.index_cast %c3_i32 : i32 to index
    %c0_58 = arith.constant 0 : index
    %c0_59 = arith.constant 0 : index
    %181 = vector.load %arg7[%180, %c0_58, %c0_59] : memref<8x8x12xf32, #tpu.memory_space<vmem>>, vector<1x8x12xf32>
    %182 = vector.shape_cast %181 : vector<1x8x12xf32> to vector<8x12xf32>
    %183 = vector.shape_cast %179 : vector<8x12xf32> to vector<1x8x12xf32>
    tpu.vector_store %arg7[%180, %c0_58, %c0_59], %183 {strides = array<i32>} : memref<8x8x12xf32, #tpu.memory_space<vmem>>, vector<1x8x12xf32>,
    %c4_i32 = arith.constant 4 : i32
    %184 = arith.index_cast %c4_i32 : i32 to index
    %c0_60 = arith.constant 0 : index
    %c0_61 = arith.constant 0 : index
    %185 = vector.load %arg2[%184, %c0_60, %c0_61] : memref<8x8x128xf32, #tpu.memory_space<vmem>>, vector<1x8x128xf32>
    %186 = vector.shape_cast %185 : vector<1x8x128xf32> to vector<8x128xf32>
    %cst_62 = arith.constant dense<0.000000e+00> : vector<8x128xf32>
    %187 = tpu.matmul %161, %3, %cst_62 {dimension_numbers = #tpu.dot_dimension_numbers<[1], [0], [0], [1], [0, 0, 1, 1], [], []>} : vector<8x32xf32>, vector<32x128xf32>, vector<8x128xf32> -> vector<8x128xf32>
    %188 = arith.addf %186, %187 : vector<8x128xf32>
    %189 = vector.extract_strided_slice %188 {offsets = [0, 0], sizes = [8, 96], strides = [1, 1]} : vector<8x128xf32> to vector<8x96xf32>
    %190 = arith.negf %189 : vector<8x96xf32>
    %191 = math.exp %190 : vector<8x96xf32>
    %cst_63 = arith.constant 1.000000e+00 : f32
    %192 = vector.broadcast %cst_63 : f32 to vector<8x96xf32>
    %193 = arith.addf %192, %191 : vector<8x96xf32>
    %194 = arith.divf %192, %193 : vector<8x96xf32>
    %195 = vector.extract_strided_slice %188 {offsets = [0, 96], sizes = [8, 32], strides = [1, 1]} : vector<8x128xf32> to vector<8x32xf32>
    %196 = math.tanh %195 : vector<8x32xf32>
    %197 = vector.extract_strided_slice %194 {offsets = [0, 0], sizes = [8, 32], strides = [1, 1]} : vector<8x96xf32> to vector<8x32xf32>
    %198 = vector.extract_strided_slice %194 {offsets = [0, 32], sizes = [8, 32], strides = [1, 1]} : vector<8x96xf32> to vector<8x32xf32>
    %199 = vector.extract_strided_slice %194 {offsets = [0, 64], sizes = [8, 32], strides = [1, 1]} : vector<8x96xf32> to vector<8x32xf32>
    %200 = arith.mulf %198, %159 : vector<8x32xf32>
    %201 = arith.mulf %197, %196 : vector<8x32xf32>
    %202 = arith.addf %200, %201 : vector<8x32xf32>
    %203 = math.tanh %202 : vector<8x32xf32>
    %204 = arith.mulf %199, %203 : vector<8x32xf32>
    %cst_64 = arith.constant dense<0.000000e+00> : vector<8x12xf32>
    %205 = tpu.matmul %204, %4, %cst_64 {dimension_numbers = #tpu.dot_dimension_numbers<[1], [0], [0], [1], [0, 0, 1, 1], [], []>} : vector<8x32xf32>, vector<32x12xf32>, vector<8x12xf32> -> vector<8x12xf32>
    %206 = vector.broadcast %5 : vector<1x12xf32> to vector<8x12xf32>
    %207 = arith.addf %205, %206 : vector<8x12xf32>
    %cst_65 = arith.constant 0.000000e+00 : f32
    %208 = vector.broadcast %cst_65 : f32 to vector<8x12xf32>
    %209 = arith.cmpf ogt, %207, %208 : vector<8x12xf32>
    %210 = math.exp %207 : vector<8x12xf32>
    %cst_66 = arith.constant 1.000000e+00 : f32
    %211 = vector.broadcast %cst_66 : f32 to vector<8x12xf32>
    %212 = arith.subf %210, %211 : vector<8x12xf32>
    %cst_67 = arith.constant 1.67326319 : f32
    %213 = vector.broadcast %cst_67 : f32 to vector<8x12xf32>
    %214 = arith.mulf %213, %212 : vector<8x12xf32>
    %215 = arith.select %209, %207, %214 : vector<8x12xi1>, vector<8x12xf32>
    %cst_68 = arith.constant 1.05070102 : f32
    %216 = vector.broadcast %cst_68 : f32 to vector<8x12xf32>
    %217 = arith.mulf %216, %215 : vector<8x12xf32>
    %cst_69 = arith.constant 1.000000e-03 : f32
    %218 = vector.broadcast %cst_69 : f32 to vector<8x12xf32>
    %219 = arith.mulf %207, %218 : vector<8x12xf32>
    %220 = arith.select %9, %217, %219 : vector<8x12xi1>, vector<8x12xf32>
    %221 = vector.broadcast %6 : vector<1x12xf32> to vector<8x12xf32>
    %222 = arith.addf %220, %221 : vector<8x12xf32>
    %223 = arith.index_cast %c4_i32 : i32 to index
    %c0_70 = arith.constant 0 : index
    %c0_71 = arith.constant 0 : index
    %224 = vector.load %arg7[%223, %c0_70, %c0_71] : memref<8x8x12xf32, #tpu.memory_space<vmem>>, vector<1x8x12xf32>
    %225 = vector.shape_cast %224 : vector<1x8x12xf32> to vector<8x12xf32>
    %226 = vector.shape_cast %222 : vector<8x12xf32> to vector<1x8x12xf32>
    tpu.vector_store %arg7[%223, %c0_70, %c0_71], %226 {strides = array<i32>} : memref<8x8x12xf32, #tpu.memory_space<vmem>>, vector<1x8x12xf32>,
    %c5_i32 = arith.constant 5 : i32
    %227 = arith.index_cast %c5_i32 : i32 to index
    %c0_72 = arith.constant 0 : index
    %c0_73 = arith.constant 0 : index
    %228 = vector.load %arg2[%227, %c0_72, %c0_73] : memref<8x8x128xf32, #tpu.memory_space<vmem>>, vector<1x8x128xf32>
    %229 = vector.shape_cast %228 : vector<1x8x128xf32> to vector<8x128xf32>
    %cst_74 = arith.constant dense<0.000000e+00> : vector<8x128xf32>
    %230 = tpu.matmul %204, %3, %cst_74 {dimension_numbers = #tpu.dot_dimension_numbers<[1], [0], [0], [1], [0, 0, 1, 1], [], []>} : vector<8x32xf32>, vector<32x128xf32>, vector<8x128xf32> -> vector<8x128xf32>
    %231 = arith.addf %229, %230 : vector<8x128xf32>
    %232 = vector.extract_strided_slice %231 {offsets = [0, 0], sizes = [8, 96], strides = [1, 1]} : vector<8x128xf32> to vector<8x96xf32>
    %233 = arith.negf %232 : vector<8x96xf32>
    %234 = math.exp %233 : vector<8x96xf32>
    %cst_75 = arith.constant 1.000000e+00 : f32
    %235 = vector.broadcast %cst_75 : f32 to vector<8x96xf32>
    %236 = arith.addf %235, %234 : vector<8x96xf32>
    %237 = arith.divf %235, %236 : vector<8x96xf32>
    %238 = vector.extract_strided_slice %231 {offsets = [0, 96], sizes = [8, 32], strides = [1, 1]} : vector<8x128xf32> to vector<8x32xf32>
    %239 = math.tanh %238 : vector<8x32xf32>
    %240 = vector.extract_strided_slice %237 {offsets = [0, 0], sizes = [8, 32], strides = [1, 1]} : vector<8x96xf32> to vector<8x32xf32>
    %241 = vector.extract_strided_slice %237 {offsets = [0, 32], sizes = [8, 32], strides = [1, 1]} : vector<8x96xf32> to vector<8x32xf32>
    %242 = vector.extract_strided_slice %237 {offsets = [0, 64], sizes = [8, 32], strides = [1, 1]} : vector<8x96xf32> to vector<8x32xf32>
    %243 = arith.mulf %241, %202 : vector<8x32xf32>
    %244 = arith.mulf %240, %239 : vector<8x32xf32>
    %245 = arith.addf %243, %244 : vector<8x32xf32>
    %246 = math.tanh %245 : vector<8x32xf32>
    %247 = arith.mulf %242, %246 : vector<8x32xf32>
    %cst_76 = arith.constant dense<0.000000e+00> : vector<8x12xf32>
    %248 = tpu.matmul %247, %4, %cst_76 {dimension_numbers = #tpu.dot_dimension_numbers<[1], [0], [0], [1], [0, 0, 1, 1], [], []>} : vector<8x32xf32>, vector<32x12xf32>, vector<8x12xf32> -> vector<8x12xf32>
    %249 = vector.broadcast %5 : vector<1x12xf32> to vector<8x12xf32>
    %250 = arith.addf %248, %249 : vector<8x12xf32>
    %cst_77 = arith.constant 0.000000e+00 : f32
    %251 = vector.broadcast %cst_77 : f32 to vector<8x12xf32>
    %252 = arith.cmpf ogt, %250, %251 : vector<8x12xf32>
    %253 = math.exp %250 : vector<8x12xf32>
    %cst_78 = arith.constant 1.000000e+00 : f32
    %254 = vector.broadcast %cst_78 : f32 to vector<8x12xf32>
    %255 = arith.subf %253, %254 : vector<8x12xf32>
    %cst_79 = arith.constant 1.67326319 : f32
    %256 = vector.broadcast %cst_79 : f32 to vector<8x12xf32>
    %257 = arith.mulf %256, %255 : vector<8x12xf32>
    %258 = arith.select %252, %250, %257 : vector<8x12xi1>, vector<8x12xf32>
    %cst_80 = arith.constant 1.05070102 : f32
    %259 = vector.broadcast %cst_80 : f32 to vector<8x12xf32>
    %260 = arith.mulf %259, %258 : vector<8x12xf32>
    %cst_81 = arith.constant 1.000000e-03 : f32
    %261 = vector.broadcast %cst_81 : f32 to vector<8x12xf32>
    %262 = arith.mulf %250, %261 : vector<8x12xf32>
    %263 = arith.select %9, %260, %262 : vector<8x12xi1>, vector<8x12xf32>
    %264 = vector.broadcast %6 : vector<1x12xf32> to vector<8x12xf32>
    %265 = arith.addf %263, %264 : vector<8x12xf32>
    %266 = arith.index_cast %c5_i32 : i32 to index
    %c0_82 = arith.constant 0 : index
    %c0_83 = arith.constant 0 : index
    %267 = vector.load %arg7[%266, %c0_82, %c0_83] : memref<8x8x12xf32, #tpu.memory_space<vmem>>, vector<1x8x12xf32>
    %268 = vector.shape_cast %267 : vector<1x8x12xf32> to vector<8x12xf32>
    %269 = vector.shape_cast %265 : vector<8x12xf32> to vector<1x8x12xf32>
    tpu.vector_store %arg7[%266, %c0_82, %c0_83], %269 {strides = array<i32>} : memref<8x8x12xf32, #tpu.memory_space<vmem>>, vector<1x8x12xf32>,
    %c6_i32 = arith.constant 6 : i32
    %270 = arith.index_cast %c6_i32 : i32 to index
    %c0_84 = arith.constant 0 : index
    %c0_85 = arith.constant 0 : index
    %271 = vector.load %arg2[%270, %c0_84, %c0_85] : memref<8x8x128xf32, #tpu.memory_space<vmem>>, vector<1x8x128xf32>
    %272 = vector.shape_cast %271 : vector<1x8x128xf32> to vector<8x128xf32>
    %cst_86 = arith.constant dense<0.000000e+00> : vector<8x128xf32>
    %273 = tpu.matmul %247, %3, %cst_86 {dimension_numbers = #tpu.dot_dimension_numbers<[1], [0], [0], [1], [0, 0, 1, 1], [], []>} : vector<8x32xf32>, vector<32x128xf32>, vector<8x128xf32> -> vector<8x128xf32>
    %274 = arith.addf %272, %273 : vector<8x128xf32>
    %275 = vector.extract_strided_slice %274 {offsets = [0, 0], sizes = [8, 96], strides = [1, 1]} : vector<8x128xf32> to vector<8x96xf32>
    %276 = arith.negf %275 : vector<8x96xf32>
    %277 = math.exp %276 : vector<8x96xf32>
    %cst_87 = arith.constant 1.000000e+00 : f32
    %278 = vector.broadcast %cst_87 : f32 to vector<8x96xf32>
    %279 = arith.addf %278, %277 : vector<8x96xf32>
    %280 = arith.divf %278, %279 : vector<8x96xf32>
    %281 = vector.extract_strided_slice %274 {offsets = [0, 96], sizes = [8, 32], strides = [1, 1]} : vector<8x128xf32> to vector<8x32xf32>
    %282 = math.tanh %281 : vector<8x32xf32>
    %283 = vector.extract_strided_slice %280 {offsets = [0, 0], sizes = [8, 32], strides = [1, 1]} : vector<8x96xf32> to vector<8x32xf32>
    %284 = vector.extract_strided_slice %280 {offsets = [0, 32], sizes = [8, 32], strides = [1, 1]} : vector<8x96xf32> to vector<8x32xf32>
    %285 = vector.extract_strided_slice %280 {offsets = [0, 64], sizes = [8, 32], strides = [1, 1]} : vector<8x96xf32> to vector<8x32xf32>
    %286 = arith.mulf %284, %245 : vector<8x32xf32>
    %287 = arith.mulf %283, %282 : vector<8x32xf32>
    %288 = arith.addf %286, %287 : vector<8x32xf32>
    %289 = math.tanh %288 : vector<8x32xf32>
    %290 = arith.mulf %285, %289 : vector<8x32xf32>
    %cst_88 = arith.constant dense<0.000000e+00> : vector<8x12xf32>
    %291 = tpu.matmul %290, %4, %cst_88 {dimension_numbers = #tpu.dot_dimension_numbers<[1], [0], [0], [1], [0, 0, 1, 1], [], []>} : vector<8x32xf32>, vector<32x12xf32>, vector<8x12xf32> -> vector<8x12xf32>
    %292 = vector.broadcast %5 : vector<1x12xf32> to vector<8x12xf32>
    %293 = arith.addf %291, %292 : vector<8x12xf32>
    %cst_89 = arith.constant 0.000000e+00 : f32
    %294 = vector.broadcast %cst_89 : f32 to vector<8x12xf32>
    %295 = arith.cmpf ogt, %293, %294 : vector<8x12xf32>
    %296 = math.exp %293 : vector<8x12xf32>
    %cst_90 = arith.constant 1.000000e+00 : f32
    %297 = vector.broadcast %cst_90 : f32 to vector<8x12xf32>
    %298 = arith.subf %296, %297 : vector<8x12xf32>
    %cst_91 = arith.constant 1.67326319 : f32
    %299 = vector.broadcast %cst_91 : f32 to vector<8x12xf32>
    %300 = arith.mulf %299, %298 : vector<8x12xf32>
    %301 = arith.select %295, %293, %300 : vector<8x12xi1>, vector<8x12xf32>
    %cst_92 = arith.constant 1.05070102 : f32
    %302 = vector.broadcast %cst_92 : f32 to vector<8x12xf32>
    %303 = arith.mulf %302, %301 : vector<8x12xf32>
    %cst_93 = arith.constant 1.000000e-03 : f32
    %304 = vector.broadcast %cst_93 : f32 to vector<8x12xf32>
    %305 = arith.mulf %293, %304 : vector<8x12xf32>
    %306 = arith.select %9, %303, %305 : vector<8x12xi1>, vector<8x12xf32>
    %307 = vector.broadcast %6 : vector<1x12xf32> to vector<8x12xf32>
    %308 = arith.addf %306, %307 : vector<8x12xf32>
    %309 = arith.index_cast %c6_i32 : i32 to index
    %c0_94 = arith.constant 0 : index
    %c0_95 = arith.constant 0 : index
    %310 = vector.load %arg7[%309, %c0_94, %c0_95] : memref<8x8x12xf32, #tpu.memory_space<vmem>>, vector<1x8x12xf32>
    %311 = vector.shape_cast %310 : vector<1x8x12xf32> to vector<8x12xf32>
    %312 = vector.shape_cast %308 : vector<8x12xf32> to vector<1x8x12xf32>
    tpu.vector_store %arg7[%309, %c0_94, %c0_95], %312 {strides = array<i32>} : memref<8x8x12xf32, #tpu.memory_space<vmem>>, vector<1x8x12xf32>,
    %c7_i32 = arith.constant 7 : i32
    %313 = arith.index_cast %c7_i32 : i32 to index
    %c0_96 = arith.constant 0 : index
    %c0_97 = arith.constant 0 : index
    %314 = vector.load %arg2[%313, %c0_96, %c0_97] : memref<8x8x128xf32, #tpu.memory_space<vmem>>, vector<1x8x128xf32>
    %315 = vector.shape_cast %314 : vector<1x8x128xf32> to vector<8x128xf32>
    %cst_98 = arith.constant dense<0.000000e+00> : vector<8x128xf32>
    %316 = tpu.matmul %290, %3, %cst_98 {dimension_numbers = #tpu.dot_dimension_numbers<[1], [0], [0], [1], [0, 0, 1, 1], [], []>} : vector<8x32xf32>, vector<32x128xf32>, vector<8x128xf32> -> vector<8x128xf32>
    %317 = arith.addf %315, %316 : vector<8x128xf32>
    %318 = vector.extract_strided_slice %317 {offsets = [0, 0], sizes = [8, 96], strides = [1, 1]} : vector<8x128xf32> to vector<8x96xf32>
    %319 = arith.negf %318 : vector<8x96xf32>
    %320 = math.exp %319 : vector<8x96xf32>
    %cst_99 = arith.constant 1.000000e+00 : f32
    %321 = vector.broadcast %cst_99 : f32 to vector<8x96xf32>
    %322 = arith.addf %321, %320 : vector<8x96xf32>
    %323 = arith.divf %321, %322 : vector<8x96xf32>
    %324 = vector.extract_strided_slice %317 {offsets = [0, 96], sizes = [8, 32], strides = [1, 1]} : vector<8x128xf32> to vector<8x32xf32>
    %325 = math.tanh %324 : vector<8x32xf32>
    %326 = vector.extract_strided_slice %323 {offsets = [0, 0], sizes = [8, 32], strides = [1, 1]} : vector<8x96xf32> to vector<8x32xf32>
    %327 = vector.extract_strided_slice %323 {offsets = [0, 32], sizes = [8, 32], strides = [1, 1]} : vector<8x96xf32> to vector<8x32xf32>
    %328 = vector.extract_strided_slice %323 {offsets = [0, 64], sizes = [8, 32], strides = [1, 1]} : vector<8x96xf32> to vector<8x32xf32>
    %329 = arith.mulf %327, %288 : vector<8x32xf32>
    %330 = arith.mulf %326, %325 : vector<8x32xf32>
    %331 = arith.addf %329, %330 : vector<8x32xf32>
    %332 = math.tanh %331 : vector<8x32xf32>
    %333 = arith.mulf %328, %332 : vector<8x32xf32>
    %cst_100 = arith.constant dense<0.000000e+00> : vector<8x12xf32>
    %334 = tpu.matmul %333, %4, %cst_100 {dimension_numbers = #tpu.dot_dimension_numbers<[1], [0], [0], [1], [0, 0, 1, 1], [], []>} : vector<8x32xf32>, vector<32x12xf32>, vector<8x12xf32> -> vector<8x12xf32>
    %335 = vector.broadcast %5 : vector<1x12xf32> to vector<8x12xf32>
    %336 = arith.addf %334, %335 : vector<8x12xf32>
    %cst_101 = arith.constant 0.000000e+00 : f32
    %337 = vector.broadcast %cst_101 : f32 to vector<8x12xf32>
    %338 = arith.cmpf ogt, %336, %337 : vector<8x12xf32>
    %339 = math.exp %336 : vector<8x12xf32>
    %cst_102 = arith.constant 1.000000e+00 : f32
    %340 = vector.broadcast %cst_102 : f32 to vector<8x12xf32>
    %341 = arith.subf %339, %340 : vector<8x12xf32>
    %cst_103 = arith.constant 1.67326319 : f32
    %342 = vector.broadcast %cst_103 : f32 to vector<8x12xf32>
    %343 = arith.mulf %342, %341 : vector<8x12xf32>
    %344 = arith.select %338, %336, %343 : vector<8x12xi1>, vector<8x12xf32>
    %cst_104 = arith.constant 1.05070102 : f32
    %345 = vector.broadcast %cst_104 : f32 to vector<8x12xf32>
    %346 = arith.mulf %345, %344 : vector<8x12xf32>
    %cst_105 = arith.constant 1.000000e-03 : f32
    %347 = vector.broadcast %cst_105 : f32 to vector<8x12xf32>
    %348 = arith.mulf %336, %347 : vector<8x12xf32>
    %349 = arith.select %9, %346, %348 : vector<8x12xi1>, vector<8x12xf32>
    %350 = vector.broadcast %6 : vector<1x12xf32> to vector<8x12xf32>
    %351 = arith.addf %349, %350 : vector<8x12xf32>
    %352 = arith.index_cast %c7_i32 : i32 to index
    %c0_106 = arith.constant 0 : index
    %c0_107 = arith.constant 0 : index
    %353 = vector.load %arg7[%352, %c0_106, %c0_107] : memref<8x8x12xf32, #tpu.memory_space<vmem>>, vector<1x8x12xf32>
    %354 = vector.shape_cast %353 : vector<1x8x12xf32> to vector<8x12xf32>
    %355 = vector.shape_cast %351 : vector<8x12xf32> to vector<1x8x12xf32>
    tpu.vector_store %arg7[%352, %c0_106, %c0_107], %355 {strides = array<i32>} : memref<8x8x12xf32, #tpu.memory_space<vmem>>, vector<1x8x12xf32>,
    %c8_i32_108 = arith.constant 8 : i32
    %c0_109 = arith.constant 0 : index
    %c0_110 = arith.constant 0 : index
    %356 = vector.load %arg8[%c0_109, %c0_110] : memref<8x32xf32, #tpu.memory_space<vmem>>, vector<8x32xf32>
    tpu.vector_store %arg8[%c0_109, %c0_110], %333 {strides = array<i32>} : memref<8x32xf32, #tpu.memory_space<vmem>>, vector<8x32xf32>,
    %c0_111 = arith.constant 0 : index
    %c0_112 = arith.constant 0 : index
    %357 = vector.load %arg9[%c0_111, %c0_112] : memref<8x32xf32, #tpu.memory_space<vmem>>, vector<8x32xf32>
    tpu.vector_store %arg9[%c0_111, %c0_112], %331 {strides = array<i32>} : memref<8x32xf32, #tpu.memory_space<vmem>>, vector<8x32xf32>,
    return
  }
  func.func @transform_0(%arg0: i32, %arg1: i32) -> (i32, i32, i32) {
    %c0_i32 = arith.constant 0 : i32
    %c0_i32_0 = arith.constant 0 : i32
    return %arg1, %arg0, %c0_i32 : i32, i32, i32
  }
  func.func @transform_1(%arg0: i32, %arg1: i32) -> (i32, i32) {
    %c0_i32 = arith.constant 0 : i32
    %c0_i32_0 = arith.constant 0 : i32
    %c0_i32_1 = arith.constant 0 : i32
    return %c0_i32, %c0_i32_0 : i32, i32
  }
  func.func @transform_2(%arg0: i32, %arg1: i32) -> (i32, i32) {
    %c0_i32 = arith.constant 0 : i32
    %c0_i32_0 = arith.constant 0 : i32
    %c0_i32_1 = arith.constant 0 : i32
    return %c0_i32, %c0_i32_0 : i32, i32
  }
  func.func @transform_3(%arg0: i32, %arg1: i32) -> (i32, i32) {
    %c0_i32 = arith.constant 0 : i32
    %c0_i32_0 = arith.constant 0 : i32
    %c0_i32_1 = arith.constant 0 : i32
    return %c0_i32, %c0_i32_0 : i32, i32
  }
  func.func @transform_4(%arg0: i32, %arg1: i32) -> (i32, i32) {
    %c0_i32 = arith.constant 0 : i32
    %c0_i32_0 = arith.constant 0 : i32
    %c0_i32_1 = arith.constant 0 : i32
    return %c0_i32, %c0_i32_0 : i32, i32
  }
  func.func @transform_5(%arg0: i32, %arg1: i32) -> (i32, i32, i32) {
    %c0_i32 = arith.constant 0 : i32
    %c0_i32_0 = arith.constant 0 : i32
    return %arg1, %arg0, %c0_i32 : i32, i32, i32
  }
}

</mosaic_0001>

<bundles_post_ra>
// kernel: tpu_custom_call.1
= control target key start
LH: loop header
LB: loop body
LE: loop exit
PB: predicated region body
PF: predicated region fallthrough
CT: control target
= control target key end

     0   :  { %10 = vsyncpa [#allocation5], 0  ;;  %s2406_s0 = inlined_call_operand.hbm [shape: f32[8,8,128], index: 0, kind: input, shape index: {}]   ;;  %s2407_s1 = inlined_call_operand.vmem [shape: f32[32,128], index: 1, kind: input, shape index: {}]   ;;  %s2408_s2 = inlined_call_operand.vmem [shape: f32[32,12], index: 2, kind: input, shape index: {}]   ;;  %s2409_s3 = inlined_call_operand.vmem [shape: f32[1,12], index: 3, kind: input, shape index: {}]   ;;  %s2410_s4 = inlined_call_operand.vmem [shape: f32[1,12], index: 4, kind: input, shape index: {}]   ;;  %s2411_s5 = inlined_call_operand.hbm [shape: f32[8,8,12], index: 5, kind: output, shape index: {}]  }
   0x1   :  { %11 = vsyncpa [#allocation6], 0  ;;  %s2096_s18 = smov [#allocation4]   ;;  %s2048_s22 = scalar_lea.hbm %s2406_s0, 1024 }
   0x2   :  { %s17_s19 = sshll.u32 %s2096_s18, 4  ;;  %p2049_p0 = scmp.ne.s32.totalorder %s2406_s0, %s2048_s22  ;;  %s18_s19 = int_to_ptr.vmem [resolvable:$true] %s17_s19 }
   0x3   :  { %p2052_p1 = scmp.lt.u32.totalorder %s2048_s22, %s2406_s0 }
   0x5   :  { %p2054_p2 = pnand %p2052_p1, %p2049_p0 }
   0x7   :  { %2057 = shalt.err (!%p2054_p2)
}
   0x8   :  { %s2058_s27 = scalar_lea.vmem %s18_s19, 1024  ;;  %p2063_p4 = scmp.lt.s32.totalorder %s18_s19, %s18_s19 }
   0x9   :  { %p2059_p3 = scmp.ne.s32.totalorder %s18_s19, %s2058_s27  ;;  %p2064_p5 = scmp.lt.s32.totalorder %s2058_s27, %s2058_s27 }
   0xb   :  { %p2065_p6 = por %p2064_p5, %p2063_p4 }
   0xd   :  { %p2066_p7 = pnand %p2065_p6, %p2059_p3 }
   0xf   :  { %2069 = shalt.err (!%p2066_p7)
}
  0x10   :  { %s2097_s28 = smov 128   ;;  %s2098_s29 = smov 8  }
  0x11   :  { %23 = dma.hbm_to_vmem [thread:$0]  %s2406_s0, 1024, %s18_s19, [#allocation5], %s2097_s28, %s2097_s28, %s2098_s29  }
  0x12   :  { %2092 = dma.done.wait [#allocation5], 1024  }
  0x13   :  { %2093 = vsyncadd [#allocation5], 4294966272  ;;  %vm39_vm0 = vcmask 261120   ;;  %v2099_v0 = vmov 0.0|0.0   ;;  %vm2100_vm1 = vmmov 0   ;;  %v2101_v1 = vmov 0.0  }
  0x14   :  { %1862 = vmatprep.subr.bf16.mxu0 %v2099_v0  ;;  %1694 = vmatprep.mubr.msk.f32.mxu0 %vm2100_vm1, %v2101_v1  ;;  %40 = vst.msk [vmem:[#allocation2] sm:$0xff] %vm39_vm0, %v2101_v1  ;;  %41 = vst.msk [vmem:[#allocation3] sm:$0xff] %vm39_vm0, %v2101_v1  ;;  %v42_v2 = vld [vmem:[%s2407_s1] sm:$0xff]  ;;  %v43_v3 = vld [vmem:[%s2407_s1 + $0x8] sm:$0xff]  ;;  %s2103_s22 = smov 64   ;;  %v52_v44 = vlaneseq  ;;  %vm258_vm4 = vcmask 97280  }
  0x15   :  { %1868 = vmatprep.subr.bf16.mxu1 %v2099_v0  ;;  %1705 = vmatprep.mubr.msk.f32.mxu1 %vm2100_vm1, %v2101_v1  ;;  %v44_v4 = vld [vmem:[%s2407_s1 + $0x10] sm:$0xff]  ;;  %v2170_v5 = vpack.c.bf16 %v43_v3, %v42_v2  ;;  %v45_v6 = vld [vmem:[%s2407_s1 + $0x18] sm:$0xff]  ;;  %s2102_s1 = smov 32   ;;  %v46_v25 = vld [vmem:[%s2408_s2] sm:$0xff]  ;;  %s2105_s25 = smov [#allocation7]  }
  0x16   :  { %v2176_v7 = vpack.c.bf16 %v45_v6, %v44_v4  ;;  %v57_v9 = vld [vmem:[#allocation4] sm:$0xff]  ;;  %v47_v26 = vld [vmem:[%s2408_s2 + $0x8] sm:$0xff]  ;;  %v49_v29 = vld [vmem:[%s2408_s2 + $0x18] sm:$0xff]  ;;  %v2237_v47 = vand.u32 127, %v52_v44  ;;  %s1560_s26 = sshll.u32 %s2105_s25, 4  ;;  %s1561_s26 = int_to_ptr.vmem [resolvable:$true] %s1560_s26 }
  0x17   :  { %1864 = vmatpush3.bf16.msra.mxu0 %v2170_v5  ;;  %v48_v27 = vld [vmem:[%s2408_s2 + $0x10] sm:$0xff]  ;;  %v2203_v28 = vpack.c.bf16 %v47_v26, %v46_v25  ;;  %v2233_v35 = vld [vmem:[%s2409_s3] ss:$0 sm:$0xff]  ;;  %v261_v36 = vld [vmem:[#allocation4 + $0x8] sm:$0xff]  ;;  %s2070_s27 = scalar_lea.vmem %s1561_s26, 1024  ;;  %p2075_p9 = scmp.lt.s32.totalorder %s1561_s26, %s1561_s26 }
  0x18   :  { %1865 = vmatprep.subr.bf16.mxu0 %v2099_v0  ;;  %v2209_v30 = vpack.c.bf16 %v49_v29, %v48_v27  ;;  %vm54_vm3 = vcmp.lt.s32.totalorder %v2237_v47, 8  ;;  %v2243_v51 = vld [vmem:[%s2410_s4] ss:$0 sm:$0xff]  ;;  %s2104_s4 = smov 96   ;;  %p2071_p8 = scmp.ne.s32.totalorder %s1561_s26, %s2070_s27 }
  0x19   :  { %1870 = vmatpush3.bf16.msra.mxu1 %v2203_v28  ;;  %p2076_p10 = scmp.lt.s32.totalorder %s2070_s27, %s2070_s27 }
  0x1a   :  { %1871 = vmatprep.subr.bf16.mxu1 %v2099_v0 }
  0x1b   :  { %1867 = vmatpush3.bf16.msra.mxu0 %v2176_v7  ;;  %v55_v8 = vld [vmem:[#allocation2] sm:$0xff]  ;;  %v56_v14 = vld [vmem:[#allocation3] sm:$0xff]  ;;  %p2077_p11 = por %p2076_p10, %p2075_p9 }
  0x1c   :  { %1874 = vmatprep.subr.bf16.mxu0 %v2099_v0 }
  0x1d   :  { %1873 = vmatpush3.bf16.msra.mxu1 %v2209_v30  ;;  %p2078_p12 = pnand %p2077_p11, %p2071_p8 }
  0x1e   :  { %1695 = vmatmul.mubr.msk.f32.vlgmr.msra.gmra.mrb[0].mxu0 %vm39_vm0, %v55_v8  ;;  %1880 = vmatprep.subr.bf16.mxu1 %v2099_v0 }
  0x1f   :  { %1876 = vmatpush3.bf16.msra.mxu0 %v2170_v5  ;;  %1716 = vmatprep.mubr.msk.f32.mxu0 %vm2100_vm1, %v2101_v1 }
  0x20   :  { %1877 = vmatprep.subr.bf16.mxu0 %v2099_v0 }
  0x23   :  { %1879 = vmatpush3.bf16.msra.mxu0 %v2176_v7 }
  0x24   :  { %1886 = vmatprep.subr.bf16.mxu0 %v2099_v0 }
  0xf1   :  { %v128_v10 = vpop.f32.mrb[0].mxu0 }
  0xf2   :  { %v132_v11 = vadd.f32 %v128_v10, %v57_v9  ;;  %v1696_v12 = vpop.f32.mrb[1].mxu0  ;;  %v445_v9 = vld [vmem:[#allocation4 + $0x10] sm:$0xff] }
  0xf4   :  { %1968 = vtanh.f32 %v132_v11  ;;  %v1573_v15 = vmul.f32 -1.442695, %v132_v11 }
  0xf6   :  { %1970 = vpow2.f32 %v1573_v15 }
  0xfe   :  { %v1969_v13 = vpop.eup %1968 }
  0xff   :  { %146 = vrot.lane.b32.xlu0 %v1969_v13, %s2102_s1 }
 0x100   :  { %v1971_v16 = vpop.eup %1970 }
 0x101   :  { %v136_v17 = vadd.f32 1.0, %v1971_v16 }
 0x103   :  { %141 = vrot.lane.b32.xlu0 %v56_v14, %s2102_s1  ;;  %1972 = vrcp.f32 %v136_v17 }
 0x10d   :  { %v1973_v18 = vpop.eup %1972 }
 0x171   :  { %v147_v19 = vpop.permute.xlu0 %146 }
 0x172   :  { %v149_v20 = vmul.f32 %v1973_v18, %v147_v19 }
 0x174   :  { %151 = vrot.lane.b32.xlu1 %v149_v20, %s2102_s1 }
 0x175   :  { %v142_v21 = vpop.permute.xlu0 %141 }
 0x176   :  { %v144_v22 = vmul.f32 %v1973_v18, %v142_v21 }
 0x1e6   :  { %v152_v23 = vpop.permute.xlu1 %151 }
 0x1e7   :  { %v2191_v24 = vadd.f32 %v152_v23, %v144_v22 }
 0x1e9   :  { %1974 = vtanh.f32 %v2191_v24 }
 0x1f3   :  { %v1975_v31 = vpop.eup %1974 }
 0x1f4   :  { %157 = vrot.lane.b32.xlu1 %v1975_v31, %s2102_s1 }
 0x266   :  { %v158_v32 = vpop.permute.xlu1 %157 }
 0x267   :  { %v160_v33 = vmul.f32 %v1973_v18, %v158_v32 }
 0x269   :  { %168 = vrot.lane.b32.xlu0 %v160_v33, %s2103_s22 }
 0x2db   :  { %v169_v34 = vpop.permute.xlu0 %168 }
 0x2dc   :  { %1706 = vmatmul.mubr.msk.f32.vlgmr.msra.gmra.mrb[0].mxu1 %vm39_vm0, %v169_v34  ;;  %1717 = vmatmul.mubr.msk.f32.vlgmr.msra.gmra.mrb[2].mxu0 %vm39_vm0, %v169_v34 }
 0x2dd   :  { %1882 = vmatpush3.bf16.msra.mxu1 %v2203_v28  ;;  %1888 = vmatpush3.bf16.msra.mxu0 %v2170_v5 }
 0x2de   :  { %1883 = vmatprep.subr.bf16.mxu1 %v2099_v0  ;;  %1889 = vmatprep.subr.bf16.mxu0 %v2099_v0 }
 0x2df   :  { %1727 = vmatprep.mubr.msk.f32.mxu1 %vm2100_vm1, %v2101_v1  ;;  %1738 = vmatprep.mubr.msk.f32.mxu0 %vm2100_vm1, %v2101_v1 }
 0x2e1   :  { %1885 = vmatpush3.bf16.msra.mxu1 %v2209_v30  ;;  %1891 = vmatpush3.bf16.msra.mxu0 %v2176_v7 }
 0x2e2   :  { %1892 = vmatprep.subr.bf16.mxu1 %v2099_v0  ;;  %1898 = vmatprep.subr.bf16.mxu0 %v2099_v0 }
 0x3af   :  { %v238_v37 = vpop.f32.mrb[0].mxu1  ;;  %v328_v38 = vpop.f32.mrb[2].mxu0 }
 0x3b0   :  { %v239_v39 = vadd.f32 %v2233_v35, %v238_v37  ;;  %v332_v40 = vadd.f32 %v328_v38, %v261_v36  ;;  %v1707_v41 = vpop.f32.mrb[1].mxu1  ;;  %v1718_v42 = vpop.f32.mrb[3].mxu0 }
 0x3b1   :  { %v629_v42 = vld [vmem:[#allocation4 + $0x18] sm:$0xff] }
 0x3b2   :  { %v243_v43 = vmul.f32 1.442695, %v239_v39  ;;  %1976 = vtanh.f32 %v332_v40  ;;  %vm242_vm2 = vcmp.gt.f32.partialorder %v239_v39, 0.0  ;;  %v249_v53 = vmul.f32 0.001, %v239_v39 }
 0x3b3   :  { %v1579_v56 = vmul.f32 -1.442695, %v332_v40 }
 0x3b4   :  { %1978 = vpow2.f32 %v243_v43 }
 0x3b5   :  { %1980 = vpow2.f32 %v1579_v56 }
 0x3bc   :  { %v1977_v45 = vpop.eup %1976 }
 0x3bd   :  { %342 = vrot.lane.b32.xlu1 %v1977_v45, %s2102_s1 }
 0x3be   :  { %v1979_v46 = vpop.eup %1978 }
 0x3bf   :  { %v1576_v48 = vadd.f32 -1.0, %v1979_v46  ;;  %v1981_v57 = vpop.eup %1980 }
 0x3c0   :  { %v336_v58 = vadd.f32 1.0, %v1981_v57 }
 0x3c1   :  { %v246_v49 = vmul.f32 1.6732632, %v1576_v48 }
 0x3c2   :  { %1982 = vrcp.f32 %v336_v58 }
 0x3c3   :  { %v247_v50 = vsel %vm242_vm2, %v239_v39, %v246_v49 }
 0x3c4   :  { %v248_v52 = vmul.f32 1.050701, %v247_v50 }
 0x3c6   :  { %v250_v54 = vsel %vm54_vm3, %v248_v52, %v249_v53 }
 0x3c7   :  { %v257_v55 = vadd.f32 %v2243_v51, %v250_v54 }
 0x3c9   :  { %259 = vst.msk [vmem:[#allocation7] sm:$0xff] %vm258_vm4, %v257_v55 }
 0x3cc   :  { %v1983_v59 = vpop.eup %1982 }
 0x3cd   :  { %v340_v62 = vmul.f32 %v1983_v59, %v2191_v24 }
 0x42f   :  { %v343_v60 = vpop.permute.xlu1 %342 }
 0x430   :  { %v345_v61 = vmul.f32 %v1983_v59, %v343_v60 }
 0x432   :  { %347 = vrot.lane.b32.xlu0 %v345_v61, %s2102_s1 }
 0x4a4   :  { %v348_v63 = vpop.permute.xlu0 %347 }
 0x4a5   :  { %v350_v2 = vadd.f32 %v348_v63, %v340_v62 }
 0x4a7   :  { %1984 = vtanh.f32 %v350_v2 }
 0x4b1   :  { %v1985_v3 = vpop.eup %1984 }
 0x4b2   :  { %353 = vrot.lane.b32.xlu1 %v1985_v3, %s2102_s1 }
 0x524   :  { %v354_v4 = vpop.permute.xlu1 %353 }
 0x525   :  { %v356_v6 = vmul.f32 %v1983_v59, %v354_v4 }
 0x527   :  { %358 = vrot.lane.b32.xlu0 %v356_v6, %s2103_s22 }
 0x599   :  { %v359_v8 = vpop.permute.xlu0 %358 }
 0x59a   :  { %1728 = vmatmul.mubr.msk.f32.vlgmr.msra.gmra.mrb[2].mxu1 %vm39_vm0, %v359_v8  ;;  %1739 = vmatmul.mubr.msk.f32.vlgmr.msra.gmra.mrb[4].mxu0 %vm39_vm0, %v359_v8 }
 0x59b   :  { %1894 = vmatpush3.bf16.msra.mxu1 %v2203_v28  ;;  %1900 = vmatpush3.bf16.msra.mxu0 %v2170_v5 }
 0x59c   :  { %1895 = vmatprep.subr.bf16.mxu1 %v2099_v0  ;;  %1901 = vmatprep.subr.bf16.mxu0 %v2099_v0 }
 0x59d   :  { %1749 = vmatprep.mubr.msk.f32.mxu1 %vm2100_vm1, %v2101_v1  ;;  %1760 = vmatprep.mubr.msk.f32.mxu0 %vm2100_vm1, %v2101_v1 }
 0x59f   :  { %1897 = vmatpush3.bf16.msra.mxu1 %v2209_v30  ;;  %1903 = vmatpush3.bf16.msra.mxu0 %v2176_v7 }
 0x5a0   :  { %1904 = vmatprep.subr.bf16.mxu1 %v2099_v0  ;;  %1910 = vmatprep.subr.bf16.mxu0 %v2099_v0 }
 0x66d   :  { %v428_v10 = vpop.f32.mrb[2].mxu1  ;;  %v512_v11 = vpop.f32.mrb[4].mxu0 }
 0x66e   :  { %v429_v12 = vadd.f32 %v2233_v35, %v428_v10  ;;  %v516_v13 = vadd.f32 %v512_v11, %v445_v9  ;;  %v1729_v14 = vpop.f32.mrb[3].mxu1  ;;  %v1740_v15 = vpop.f32.mrb[5].mxu0 }
 0x66f   :  { %v813_v14 = vld [vmem:[#allocation4 + $0x20] sm:$0xff] }
 0x670   :  { %v433_v16 = vmul.f32 1.442695, %v429_v12  ;;  %1986 = vtanh.f32 %v516_v13  ;;  %vm432_vm5 = vcmp.gt.f32.partialorder %v429_v12, 0.0  ;;  %v439_v23 = vmul.f32 0.001, %v429_v12 }
 0x671   :  { %v1583_v26 = vmul.f32 -1.442695, %v516_v13 }
 0x672   :  { %1988 = vpow2.f32 %v433_v16 }
 0x673   :  { %1990 = vpow2.f32 %v1583_v26 }
 0x67a   :  { %v1987_v17 = vpop.eup %1986 }
 0x67b   :  { %526 = vrot.lane.b32.xlu1 %v1987_v17, %s2102_s1 }
 0x67c   :  { %v1989_v18 = vpop.eup %1988 }
 0x67d   :  { %v1581_v19 = vadd.f32 -1.0, %v1989_v18  ;;  %v1991_v27 = vpop.eup %1990 }
 0x67e   :  { %v520_v29 = vadd.f32 1.0, %v1991_v27 }
 0x67f   :  { %v436_v20 = vmul.f32 1.6732632, %v1581_v19 }
 0x680   :  { %1992 = vrcp.f32 %v520_v29 }
 0x681   :  { %v437_v21 = vsel %vm432_vm5, %v429_v12, %v436_v20 }
 0x682   :  { %v438_v22 = vmul.f32 1.050701, %v437_v21 }
 0x684   :  { %v440_v24 = vsel %vm54_vm3, %v438_v22, %v439_v23 }
 0x685   :  { %v441_v25 = vadd.f32 %v2243_v51, %v440_v24 }
 0x687   :  { %443 = vst.msk [vmem:[#allocation7 + $0x8] sm:$0xff] %vm258_vm4, %v441_v25 }
 0x68a   :  { %v1993_v31 = vpop.eup %1992 }
 0x68b   :  { %v524_v34 = vmul.f32 %v1993_v31, %v350_v2 }
 0x6ed   :  { %v527_v32 = vpop.permute.xlu1 %526 }
 0x6ee   :  { %v529_v33 = vmul.f32 %v1993_v31, %v527_v32 }
 0x6f0   :  { %531 = vrot.lane.b32.xlu0 %v529_v33, %s2102_s1 }
 0x762   :  { %v532_v36 = vpop.permute.xlu0 %531 }
 0x763   :  { %v534_v37 = vadd.f32 %v532_v36, %v524_v34 }
 0x765   :  { %1994 = vtanh.f32 %v534_v37 }
 0x76f   :  { %v1995_v38 = vpop.eup %1994 }
 0x770   :  { %537 = vrot.lane.b32.xlu1 %v1995_v38, %s2102_s1 }
 0x7e2   :  { %v538_v39 = vpop.permute.xlu1 %537 }
 0x7e3   :  { %v540_v40 = vmul.f32 %v1993_v31, %v538_v39 }
 0x7e5   :  { %542 = vrot.lane.b32.xlu0 %v540_v40, %s2103_s22 }
 0x857   :  { %v543_v41 = vpop.permute.xlu0 %542 }
 0x858   :  { %1750 = vmatmul.mubr.msk.f32.vlgmr.msra.gmra.mrb[4].mxu1 %vm39_vm0, %v543_v41  ;;  %1761 = vmatmul.mubr.msk.f32.vlgmr.msra.gmra.mrb[6].mxu0 %vm39_vm0, %v543_v41 }
 0x859   :  { %1906 = vmatpush3.bf16.msra.mxu1 %v2203_v28  ;;  %1912 = vmatpush3.bf16.msra.mxu0 %v2170_v5 }
 0x85a   :  { %1907 = vmatprep.subr.bf16.mxu1 %v2099_v0  ;;  %1913 = vmatprep.subr.bf16.mxu0 %v2099_v0 }
 0x85b   :  { %1771 = vmatprep.mubr.msk.f32.mxu1 %vm2100_vm1, %v2101_v1  ;;  %1782 = vmatprep.mubr.msk.f32.mxu0 %vm2100_vm1, %v2101_v1 }
 0x85d   :  { %1909 = vmatpush3.bf16.msra.mxu1 %v2209_v30  ;;  %1915 = vmatpush3.bf16.msra.mxu0 %v2176_v7 }
 0x85e   :  { %1916 = vmatprep.subr.bf16.mxu1 %v2099_v0  ;;  %1922 = vmatprep.subr.bf16.mxu0 %v2099_v0 }
 0x92b   :  { %v612_v43 = vpop.f32.mrb[4].mxu1  ;;  %v696_v44 = vpop.f32.mrb[6].mxu0 }
 0x92c   :  { %v613_v45 = vadd.f32 %v2233_v35, %v612_v43  ;;  %v700_v46 = vadd.f32 %v696_v44, %v629_v42  ;;  %v1751_v48 = vpop.f32.mrb[5].mxu1  ;;  %v1762_v49 = vpop.f32.mrb[7].mxu0 }
 0x92d   :  { %v997_v48 = vld [vmem:[#allocation4 + $0x28] sm:$0xff] }
 0x92e   :  { %v617_v50 = vmul.f32 1.442695, %v613_v45  ;;  %1996 = vtanh.f32 %v700_v46  ;;  %vm616_vm6 = vcmp.gt.f32.partialorder %v613_v45, 0.0  ;;  %v623_v58 = vmul.f32 0.001, %v613_v45 }
 0x92f   :  { %v1587_v61 = vmul.f32 -1.442695, %v700_v46 }
 0x930   :  { %1998 = vpow2.f32 %v617_v50 }
 0x931   :  { %2000 = vpow2.f32 %v1587_v61 }
 0x938   :  { %v1997_v52 = vpop.eup %1996 }
 0x939   :  { %710 = vrot.lane.b32.xlu1 %v1997_v52, %s2102_s1 }
 0x93a   :  { %v1999_v53 = vpop.eup %1998 }
 0x93b   :  { %v1585_v54 = vadd.f32 -1.0, %v1999_v53  ;;  %v2001_v62 = vpop.eup %2000 }
 0x93c   :  { %v704_v63 = vadd.f32 1.0, %v2001_v62 }
 0x93d   :  { %v620_v55 = vmul.f32 1.6732632, %v1585_v54 }
 0x93e   :  { %2002 = vrcp.f32 %v704_v63 }
 0x93f   :  { %v621_v56 = vsel %vm616_vm6, %v613_v45, %v620_v55 }
 0x940   :  { %v622_v57 = vmul.f32 1.050701, %v621_v56 }
 0x942   :  { %v624_v59 = vsel %vm54_vm3, %v622_v57, %v623_v58 }
 0x943   :  { %v625_v60 = vadd.f32 %v2243_v51, %v624_v59 }
 0x945   :  { %627 = vst.msk [vmem:[#allocation7 + $0x10] sm:$0xff] %vm258_vm4, %v625_v60 }
 0x948   :  { %v2003_v2 = vpop.eup %2002 }
 0x949   :  { %v708_v6 = vmul.f32 %v2003_v2, %v534_v37 }
 0x9ab   :  { %v711_v3 = vpop.permute.xlu1 %710 }
 0x9ac   :  { %v713_v4 = vmul.f32 %v2003_v2, %v711_v3 }
 0x9ae   :  { %715 = vrot.lane.b32.xlu0 %v713_v4, %s2102_s1 }
 0xa20   :  { %v716_v8 = vpop.permute.xlu0 %715 }
 0xa21   :  { %v718_v9 = vadd.f32 %v716_v8, %v708_v6 }
 0xa23   :  { %2004 = vtanh.f32 %v718_v9 }
 0xa2d   :  { %v2005_v10 = vpop.eup %2004 }
 0xa2e   :  { %721 = vrot.lane.b32.xlu1 %v2005_v10, %s2102_s1 }
 0xaa0   :  { %v722_v11 = vpop.permute.xlu1 %721 }
 0xaa1   :  { %v724_v12 = vmul.f32 %v2003_v2, %v722_v11 }
 0xaa3   :  { %726 = vrot.lane.b32.xlu0 %v724_v12, %s2103_s22 }
 0xb15   :  { %v727_v13 = vpop.permute.xlu0 %726 }
 0xb16   :  { %1772 = vmatmul.mubr.msk.f32.vlgmr.msra.gmra.mrb[6].mxu1 %vm39_vm0, %v727_v13  ;;  %1783 = vmatmul.mubr.msk.f32.vlgmr.msra.gmra.mrb[8].mxu0 %vm39_vm0, %v727_v13 }
 0xb17   :  { %1918 = vmatpush3.bf16.msra.mxu1 %v2203_v28  ;;  %1924 = vmatpush3.bf16.msra.mxu0 %v2170_v5 }
 0xb18   :  { %1919 = vmatprep.subr.bf16.mxu1 %v2099_v0  ;;  %1925 = vmatprep.subr.bf16.mxu0 %v2099_v0 }
 0xb19   :  { %1793 = vmatprep.mubr.msk.f32.mxu1 %vm2100_vm1, %v2101_v1  ;;  %1804 = vmatprep.mubr.msk.f32.mxu0 %vm2100_vm1, %v2101_v1 }
 0xb1b   :  { %1921 = vmatpush3.bf16.msra.mxu1 %v2209_v30  ;;  %1927 = vmatpush3.bf16.msra.mxu0 %v2176_v7 }
 0xb1c   :  { %1928 = vmatprep.subr.bf16.mxu1 %v2099_v0  ;;  %1934 = vmatprep.subr.bf16.mxu0 %v2099_v0 }
 0xbe9   :  { %v796_v15 = vpop.f32.mrb[6].mxu1  ;;  %v880_v16 = vpop.f32.mrb[8].mxu0 }
 0xbea   :  { %v797_v17 = vadd.f32 %v2233_v35, %v796_v15  ;;  %v884_v18 = vadd.f32 %v880_v16, %v813_v14  ;;  %v1773_v19 = vpop.f32.mrb[7].mxu1  ;;  %v1784_v20 = vpop.f32.mrb[9].mxu0 }
 0xbeb   :  { %v1181_v19 = vld [vmem:[#allocation4 + $0x30] sm:$0xff] }
 0xbec   :  { %v801_v21 = vmul.f32 1.442695, %v797_v17  ;;  %2006 = vtanh.f32 %v884_v18  ;;  %vm800_vm7 = vcmp.gt.f32.partialorder %v797_v17, 0.0  ;;  %v807_v29 = vmul.f32 0.001, %v797_v17 }
 0xbed   :  { %v1591_v33 = vmul.f32 -1.442695, %v884_v18 }
 0xbee   :  { %2008 = vpow2.f32 %v801_v21 }
 0xbef   :  { %2010 = vpow2.f32 %v1591_v33 }
 0xbf6   :  { %v2007_v22 = vpop.eup %2006 }
 0xbf7   :  { %894 = vrot.lane.b32.xlu1 %v2007_v22, %s2102_s1 }
 0xbf8   :  { %v2009_v23 = vpop.eup %2008 }
 0xbf9   :  { %v1589_v24 = vadd.f32 -1.0, %v2009_v23  ;;  %v2011_v34 = vpop.eup %2010 }
 0xbfa   :  { %v888_v36 = vadd.f32 1.0, %v2011_v34 }
 0xbfb   :  { %v804_v25 = vmul.f32 1.6732632, %v1589_v24 }
 0xbfc   :  { %2012 = vrcp.f32 %v888_v36 }
 0xbfd   :  { %v805_v26 = vsel %vm800_vm7, %v797_v17, %v804_v25 }
 0xbfe   :  { %v806_v27 = vmul.f32 1.050701, %v805_v26 }
 0xc00   :  { %v808_v31 = vsel %vm54_vm3, %v806_v27, %v807_v29 }
 0xc01   :  { %v809_v32 = vadd.f32 %v2243_v51, %v808_v31 }
 0xc03   :  { %811 = vst.msk [vmem:[#allocation7 + $0x18] sm:$0xff] %vm258_vm4, %v809_v32 }
 0xc06   :  { %v2013_v37 = vpop.eup %2012 }
 0xc07   :  { %v892_v40 = vmul.f32 %v2013_v37, %v718_v9 }
 0xc69   :  { %v895_v38 = vpop.permute.xlu1 %894 }
 0xc6a   :  { %v897_v39 = vmul.f32 %v2013_v37, %v895_v38 }
 0xc6c   :  { %899 = vrot.lane.b32.xlu0 %v897_v39, %s2102_s1 }
 0xcde   :  { %v900_v41 = vpop.permute.xlu0 %899 }
 0xcdf   :  { %v902_v42 = vadd.f32 %v900_v41, %v892_v40 }
 0xce1   :  { %2014 = vtanh.f32 %v902_v42 }
 0xceb   :  { %v2015_v43 = vpop.eup %2014 }
 0xcec   :  { %905 = vrot.lane.b32.xlu1 %v2015_v43, %s2102_s1 }
 0xd5e   :  { %v906_v44 = vpop.permute.xlu1 %905 }
 0xd5f   :  { %v908_v45 = vmul.f32 %v2013_v37, %v906_v44 }
 0xd61   :  { %910 = vrot.lane.b32.xlu0 %v908_v45, %s2103_s22 }
 0xdd3   :  { %v911_v46 = vpop.permute.xlu0 %910 }
 0xdd4   :  { %1794 = vmatmul.mubr.msk.f32.vlgmr.msra.gmra.mrb[8].mxu1 %vm39_vm0, %v911_v46  ;;  %1805 = vmatmul.mubr.msk.f32.vlgmr.msra.gmra.mrb[10].mxu0 %vm39_vm0, %v911_v46 }
 0xdd5   :  { %1930 = vmatpush3.bf16.msra.mxu1 %v2203_v28  ;;  %1936 = vmatpush3.bf16.msra.mxu0 %v2170_v5 }
 0xdd6   :  { %1931 = vmatprep.subr.bf16.mxu1 %v2099_v0  ;;  %1937 = vmatprep.subr.bf16.mxu0 %v2099_v0 }
 0xdd7   :  { %1815 = vmatprep.mubr.msk.f32.mxu1 %vm2100_vm1, %v2101_v1  ;;  %1826 = vmatprep.mubr.msk.f32.mxu0 %vm2100_vm1, %v2101_v1 }
 0xdd9   :  { %1933 = vmatpush3.bf16.msra.mxu1 %v2209_v30  ;;  %1939 = vmatpush3.bf16.msra.mxu0 %v2176_v7 }
 0xdda   :  { %1940 = vmatprep.subr.bf16.mxu1 %v2099_v0  ;;  %1946 = vmatprep.subr.bf16.mxu0 %v2099_v0 }
 0xea7   :  { %v980_v49 = vpop.f32.mrb[8].mxu1  ;;  %v1064_v50 = vpop.f32.mrb[10].mxu0 }
 0xea8   :  { %v981_v52 = vadd.f32 %v2233_v35, %v980_v49  ;;  %v1068_v53 = vadd.f32 %v1064_v50, %v997_v48  ;;  %v1795_v54 = vpop.f32.mrb[9].mxu1  ;;  %v1806_v55 = vpop.f32.mrb[11].mxu0 }
 0xeaa   :  { %v985_v56 = vmul.f32 1.442695, %v981_v52  ;;  %2016 = vtanh.f32 %v1068_v53  ;;  %vm984_vm8 = vcmp.gt.f32.partialorder %v981_v52, 0.0  ;;  %v991_v63 = vmul.f32 0.001, %v981_v52 }
 0xeab   :  { %v1595_v4 = vmul.f32 -1.442695, %v1068_v53 }
 0xeac   :  { %2018 = vpow2.f32 %v985_v56 }
 0xead   :  { %2020 = vpow2.f32 %v1595_v4 }
 0xeb4   :  { %v2017_v57 = vpop.eup %2016 }
 0xeb5   :  { %1078 = vrot.lane.b32.xlu1 %v2017_v57, %s2102_s1 }
 0xeb6   :  { %v2019_v58 = vpop.eup %2018 }
 0xeb7   :  { %v1593_v59 = vadd.f32 -1.0, %v2019_v58  ;;  %v2021_v6 = vpop.eup %2020 }
 0xeb8   :  { %v1072_v8 = vadd.f32 1.0, %v2021_v6 }
 0xeb9   :  { %v988_v60 = vmul.f32 1.6732632, %v1593_v59 }
 0xeba   :  { %2022 = vrcp.f32 %v1072_v8 }
 0xebb   :  { %v989_v61 = vsel %vm984_vm8, %v981_v52, %v988_v60  ;;  %v1365_v52 = vld [vmem:[#allocation4 + $0x38] sm:$0xff] }
 0xebc   :  { %v990_v62 = vmul.f32 1.050701, %v989_v61 }
 0xebe   :  { %v992_v2 = vsel %vm54_vm3, %v990_v62, %v991_v63 }
 0xebf   :  { %v993_v3 = vadd.f32 %v2243_v51, %v992_v2 }
 0xec1   :  { %995 = vst.msk [vmem:[#allocation7 + $0x20] sm:$0xff] %vm258_vm4, %v993_v3 }
 0xec4   :  { %v2023_v9 = vpop.eup %2022 }
 0xec5   :  { %v1076_v12 = vmul.f32 %v2023_v9, %v902_v42 }
 0xf27   :  { %v1079_v10 = vpop.permute.xlu1 %1078 }
 0xf28   :  { %v1081_v11 = vmul.f32 %v2023_v9, %v1079_v10 }
 0xf2a   :  { %1083 = vrot.lane.b32.xlu0 %v1081_v11, %s2102_s1 }
 0xf9c   :  { %v1084_v13 = vpop.permute.xlu0 %1083 }
 0xf9d   :  { %v1086_v14 = vadd.f32 %v1084_v13, %v1076_v12 }
 0xf9f   :  { %2024 = vtanh.f32 %v1086_v14 }
 0xfa9   :  { %v2025_v15 = vpop.eup %2024 }
 0xfaa   :  { %1089 = vrot.lane.b32.xlu1 %v2025_v15, %s2102_s1 }
0x101c   :  { %v1090_v16 = vpop.permute.xlu1 %1089 }
0x101d   :  { %v1092_v17 = vmul.f32 %v2023_v9, %v1090_v16 }
0x101f   :  { %1094 = vrot.lane.b32.xlu0 %v1092_v17, %s2103_s22 }
0x1091   :  { %v1095_v18 = vpop.permute.xlu0 %1094 }
0x1092   :  { %1816 = vmatmul.mubr.msk.f32.vlgmr.msra.gmra.mrb[10].mxu1 %vm39_vm0, %v1095_v18  ;;  %1827 = vmatmul.mubr.msk.f32.vlgmr.msra.gmra.mrb[12].mxu0 %vm39_vm0, %v1095_v18 }
0x1093   :  { %1942 = vmatpush3.bf16.msra.mxu1 %v2203_v28  ;;  %1948 = vmatpush3.bf16.msra.mxu0 %v2170_v5 }
0x1094   :  { %1943 = vmatprep.subr.bf16.mxu1 %v2099_v0  ;;  %1949 = vmatprep.subr.bf16.mxu0 %v2099_v0 }
0x1095   :  { %1837 = vmatprep.mubr.msk.f32.mxu1 %vm2100_vm1, %v2101_v1  ;;  %1848 = vmatprep.mubr.msk.f32.mxu0 %vm2100_vm1, %v2101_v1 }
0x1097   :  { %1945 = vmatpush3.bf16.msra.mxu1 %v2209_v30  ;;  %1951 = vmatpush3.bf16.msra.mxu0 %v2176_v7 }
0x1098   :  { %1952 = vmatprep.subr.bf16.mxu1 %v2099_v0 }
0x1165   :  { %v1164_v20 = vpop.f32.mrb[10].mxu1  ;;  %v1248_v21 = vpop.f32.mrb[12].mxu0 }
0x1166   :  { %v1165_v5 = vadd.f32 %v2233_v35, %v1164_v20  ;;  %v1252_v22 = vadd.f32 %v1248_v21, %v1181_v19  ;;  %v1817_v23 = vpop.f32.mrb[11].mxu1  ;;  %v1828_v24 = vpop.f32.mrb[13].mxu0 }
0x1168   :  { %v1169_v25 = vmul.f32 1.442695, %v1165_v5  ;;  %2026 = vtanh.f32 %v1252_v22  ;;  %vm1168_vm9 = vcmp.gt.f32.partialorder %v1165_v5, 0.0  ;;  %v1175_v33 = vmul.f32 0.001, %v1165_v5 }
0x1169   :  { %v1599_v37 = vmul.f32 -1.442695, %v1252_v22 }
0x116a   :  { %2028 = vpow2.f32 %v1169_v25 }
0x116b   :  { %2030 = vpow2.f32 %v1599_v37 }
0x1172   :  { %v2027_v26 = vpop.eup %2026 }
0x1173   :  { %1262 = vrot.lane.b32.xlu1 %v2027_v26, %s2102_s1 }
0x1174   :  { %v2029_v27 = vpop.eup %2028 }
0x1175   :  { %v1597_v29 = vadd.f32 -1.0, %v2029_v27  ;;  %v2031_v38 = vpop.eup %2030 }
0x1176   :  { %v1256_v39 = vadd.f32 1.0, %v2031_v38 }
0x1177   :  { %v1172_v31 = vmul.f32 1.6732632, %v1597_v29 }
0x1178   :  { %2032 = vrcp.f32 %v1256_v39 }
0x1179   :  { %v1173_v7 = vsel %vm1168_vm9, %v1165_v5, %v1172_v31 }
0x117a   :  { %v1174_v32 = vmul.f32 1.050701, %v1173_v7 }
0x117c   :  { %v1176_v34 = vsel %vm54_vm3, %v1174_v32, %v1175_v33 }
0x117d   :  { %v1177_v36 = vadd.f32 %v2243_v51, %v1176_v34 }
0x117f   :  { %1179 = vst.msk [vmem:[#allocation7 + $0x28] sm:$0xff] %vm258_vm4, %v1177_v36 }
0x1182   :  { %v2033_v40 = vpop.eup %2032 }
0x1183   :  { %v1260_v43 = vmul.f32 %v2033_v40, %v1086_v14 }
0x11e5   :  { %v1263_v41 = vpop.permute.xlu1 %1262 }
0x11e6   :  { %v1265_v42 = vmul.f32 %v2033_v40, %v1263_v41 }
0x11e8   :  { %1267 = vrot.lane.b32.xlu0 %v1265_v42, %s2102_s1 }
0x125a   :  { %v1268_v44 = vpop.permute.xlu0 %1267 }
0x125b   :  { %v1270_v45 = vadd.f32 %v1268_v44, %v1260_v43 }
0x125d   :  { %2034 = vtanh.f32 %v1270_v45 }
0x1267   :  { %v2035_v46 = vpop.eup %2034 }
0x1268   :  { %1273 = vrot.lane.b32.xlu1 %v2035_v46, %s2102_s1 }
0x12da   :  { %v1274_v48 = vpop.permute.xlu1 %1273 }
0x12db   :  { %v1276_v49 = vmul.f32 %v2033_v40, %v1274_v48 }
0x12dd   :  { %1278 = vrot.lane.b32.xlu0 %v1276_v49, %s2103_s22 }
0x134f   :  { %v1279_v50 = vpop.permute.xlu0 %1278 }
0x1350   :  { %1838 = vmatmul.mubr.msk.f32.vlgmr.msra.gmra.mrb[12].mxu1 %vm39_vm0, %v1279_v50  ;;  %1849 = vmatmul.mubr.msk.f32.vlgmr.msra.gmra.mrb[14].mxu0 %vm39_vm0, %v1279_v50 }
0x1351   :  { %1954 = vmatpush3.bf16.msra.mxu1 %v2203_v28  ;;  %1859 = vmatprep.mubr.msk.f32.mxu1 %vm2100_vm1, %v2101_v1 }
0x1352   :  { %1955 = vmatprep.subr.bf16.mxu1 %v2099_v0 }
0x1355   :  { %1957 = vmatpush3.bf16.msra.mxu1 %v2209_v30 }
0x1423   :  { %v1348_v53 = vpop.f32.mrb[12].mxu1  ;;  %v1432_v54 = vpop.f32.mrb[14].mxu0 }
0x1424   :  { %v1349_v55 = vadd.f32 %v2233_v35, %v1348_v53  ;;  %v1436_v56 = vadd.f32 %v1432_v54, %v1365_v52  ;;  %v1839_v57 = vpop.f32.mrb[13].mxu1  ;;  %v1850_v58 = vpop.f32.mrb[15].mxu0 }
0x1426   :  { %v1353_v59 = vmul.f32 1.442695, %v1349_v55  ;;  %2036 = vtanh.f32 %v1436_v56  ;;  %vm1352_vm10 = vcmp.gt.f32.partialorder %v1349_v55, 0.0  ;;  %v1359_v62 = vmul.f32 0.001, %v1349_v55 }
0x1427   :  { %v1603_v3 = vmul.f32 -1.442695, %v1436_v56 }
0x1428   :  { %2038 = vpow2.f32 %v1353_v59 }
0x1429   :  { %2040 = vpow2.f32 %v1603_v3 }
0x1430   :  { %v2037_v60 = vpop.eup %2036 }
0x1431   :  { %1446 = vrot.lane.b32.xlu1 %v2037_v60, %s2102_s1 }
0x1432   :  { %v2039_v28 = vpop.eup %2038 }
0x1433   :  { %v1601_v1 = vadd.f32 -1.0, %v2039_v28  ;;  %v2041_v4 = vpop.eup %2040 }
0x1434   :  { %v1440_v6 = vadd.f32 1.0, %v2041_v4 }
0x1435   :  { %v1356_v61 = vmul.f32 1.6732632, %v1601_v1 }
0x1436   :  { %2042 = vrcp.f32 %v1440_v6 }
0x1437   :  { %v1357_v0 = vsel %vm1352_vm10, %v1349_v55, %v1356_v61 }
0x1438   :  { %v1358_v30 = vmul.f32 1.050701, %v1357_v0 }
0x143a   :  { %v1360_v63 = vsel %vm54_vm3, %v1358_v30, %v1359_v62 }
0x143b   :  { %v1361_v2 = vadd.f32 %v2243_v51, %v1360_v63 }
0x143d   :  { %1363 = vst.msk [vmem:[#allocation7 + $0x30] sm:$0xff] %vm258_vm4, %v1361_v2 }
0x1440   :  { %v2043_v8 = vpop.eup %2042 }
0x1441   :  { %v1444_v11 = vmul.f32 %v2043_v8, %v1270_v45 }
0x14a3   :  { %v1447_v9 = vpop.permute.xlu1 %1446 }
0x14a4   :  { %v1449_v10 = vmul.f32 %v2043_v8, %v1447_v9 }
0x14a6   :  { %1451 = vrot.lane.b32.xlu0 %v1449_v10, %s2102_s1 }
0x1518   :  { %v1452_v12 = vpop.permute.xlu0 %1451 }
0x1519   :  { %v1454_v13 = vadd.f32 %v1452_v12, %v1444_v11 }
0x151b   :  { %2044 = vtanh.f32 %v1454_v13 }
0x1525   :  { %v2045_v14 = vpop.eup %2044 }
0x1526   :  { %1457 = vrot.lane.b32.xlu1 %v2045_v14, %s2102_s1 }
0x152a   :  { %1551 = vrot.lane.b32.xlu1 %v1454_v13, %s2104_s4 }
0x1598   :  { %v1458_v15 = vpop.permute.xlu1 %1457 }
0x1599   :  { %v1460_v16 = vmul.f32 %v2043_v8, %v1458_v15 }
0x159b   :  { %1462 = vrot.lane.b32.xlu0 %v1460_v16, %s2103_s22 }
0x159c   :  { %v1552_v17 = vpop.permute.xlu1 %1551 }
0x159d   :  { %1554 = vst.msk [vmem:[#allocation3] sm:$0xff] %vm39_vm0, %v1552_v17 }
0x160d   :  { %v1463_v18 = vpop.permute.xlu0 %1462 }
0x160e   :  { %1549 = vst.msk [vmem:[#allocation2] sm:$0xff] %vm39_vm0, %v1463_v18  ;;  %1860 = vmatmul.mubr.msk.f32.vlgmr.msra.gmra.mrb[14].mxu1 %vm39_vm0, %v1463_v18 }
0x16e1   :  { %v1532_v19 = vpop.f32.mrb[14].mxu1 }
0x16e2   :  { %v1533_v20 = vadd.f32 %v2233_v35, %v1532_v19  ;;  %v1861_v21 = vpop.f32.mrb[15].mxu1 }
0x16e4   :  { %v1537_v5 = vmul.f32 1.442695, %v1533_v20  ;;  %vm1536_vm11 = vcmp.gt.f32.partialorder %v1533_v20, 0.0  ;;  %v1543_v27 = vmul.f32 0.001, %v1533_v20 }
0x16e6   :  { %2046 = vpow2.f32 %v1537_v5 }
0x16f0   :  { %v2047_v22 = vpop.eup %2046 }
0x16f1   :  { %v1605_v23 = vadd.f32 -1.0, %v2047_v22 }
0x16f3   :  { %v1540_v24 = vmul.f32 1.6732632, %v1605_v23 }
0x16f5   :  { %v1541_v25 = vsel %vm1536_vm11, %v1533_v20, %v1540_v24 }
0x16f6   :  { %v1542_v26 = vmul.f32 1.050701, %v1541_v25 }
0x16f8   :  { %v1544_v29 = vsel %vm54_vm3, %v1542_v26, %v1543_v27 }
0x16f9   :  { %v1545_v31 = vadd.f32 %v2243_v51, %v1544_v29 }
0x16fb   :  { %1547 = vst.msk [vmem:[#allocation7 + $0x38] sm:$0xff] %vm258_vm4, %v1545_v31 }
0x16fc   :  { %2081 = shalt.err (!%p2078_p12)
}
0x16fd   :  { %s2082_s0 = scalar_lea.hbm %s2411_s5, 1024 }
0x16fe   :  { %p2083_p13 = scmp.ne.s32.totalorder %s2411_s5, %s2082_s0  ;;  %p2086_p0 = scmp.lt.u32.totalorder %s2082_s0, %s2411_s5 }
0x1700   :  { %p2088_p1 = pnand %p2086_p0, %p2083_p13 }
0x1702   :  { %2091 = shalt.err (!%p2088_p1)
}
0x1703   :  { %1566 = dma.vmem_to_hbm [thread:$0]  %s1561_s26, 1024, %s2411_s5, [#allocation6], %s2097_s28, %s2097_s28, %s2098_s29  }
0x1704   :  { %2094 = dma.done.wait [#allocation6], 1024  }
0x1705   :  { %2095 = vsyncadd [#allocation6], 4294966272 }
0x1706   :  { %1570 = vsyncpa [#allocation5], 1 }
0x1707   :  { %1571 = vsyncpa [#allocation6], 1 }

</bundles_post_ra>
